<compile_context>
chip_gen: v5e
topology: v5e:2x2
jax: 0.10.0
libtpu: 0.0.40
codegen_flags: <defaults>
</compile_context>

<pallas_src>
import functools

import jax
import jax.numpy as jnp
import numpy as np
from jax.experimental import pallas as pl
from jax.experimental.pallas import tpu as pltpu

_LANES = 128


def _kwta_kernel(x_ref, o_ref, *, k):
    """x_ref / o_ref: (R, S, 128) block = R flattened samples (native dtype)."""
    x = x_ref[...]                                    # (R, S, 128) native dtype
    xf = x.astype(jnp.float32)                        # exact for f32 / bf16
    bits = pltpu.bitcast(xf, jnp.int32)               # reinterpret, no data move

    # Monotonic key: signed-int32 order of `key` == float order of `xf`
    # (negative floats get their low 31 bits flipped).
    mask31 = jnp.int32(0x7FFFFFFF)
    key = jnp.where(bits >= 0, bits, bits ^ mask31)

    kk = jnp.int32(k)

    def count_ge(cand):                               # cand: (R, 1, 1) int32
        c = (key >= cand).astype(jnp.int32)
        # Sublane axis first (plain vreg adds), then one lane reduce per row.
        c = jnp.sum(c, axis=1, keepdims=True)         # (R, 1, 128)
        return jnp.sum(c, axis=2, keepdims=True)      # (R, 1, 1)

    zero = jnp.zeros((key.shape[0], 1, 1), jnp.int32)
    int_min = jnp.full_like(zero, jnp.iinfo(jnp.int32).min)

    # Sign decision: is the k-th largest >= +0.0 ?  (handles the key sign bit)
    base = jnp.where(count_ge(zero) >= kk, zero, int_min)

    # Exact bisection over the remaining 31 bits:
    #   thr_key = max{ K : count(key >= K) >= k } = key of the k-th largest.
    # Unrolled static loop: 31 cheap compare+count passes with constant bits.
    prefix = zero
    for b in range(30, -1, -1):
        bit = jnp.int32(1 << b)
        cand = base + prefix + bit                    # never overflows int32
        prefix = jnp.where(count_ge(cand) >= kk, prefix + bit, prefix)

    thr_key = base + prefix                           # (R, 1, 1) per-row key
    # key compare == float compare, so this reproduces comp = (x >= topval).
    o_ref[...] = jnp.where(key >= thr_key, x, jnp.zeros_like(x))


def kwta(x, sr):
    """kWTA forward. x: (B, ...) float array. Returns same shape/dtype."""
    orig_shape = x.shape
    orig_dtype = x.dtype
    B = x.shape[0]
    N = int(np.prod(x.shape[1:]))
    k = int(sr * N)
    assert 1 <= k <= N, "need 1 <= int(sr * flattened_size) <= flattened_size"

    # Flatten per sample exactly like torch's .view(B, -1).  Keep f32 / bf16
    # inputs in their native dtype (halves HBM traffic for bf16); anything
    # else is computed in f32.
    x_flat = x.reshape(B, N)
    if x_flat.dtype not in (jnp.dtype(jnp.float32), jnp.dtype(jnp.bfloat16)):
        x_flat = x_flat.astype(jnp.float32)
    cdtype = x_flat.dtype

    n_pad = (-N) % _LANES
    if n_pad:
        # -inf padding never becomes a winner and never perturbs the >=k counts.
        x_flat = jnp.pad(x_flat, ((0, 0), (0, n_pad)), constant_values=-jnp.inf)
    S = (N + n_pad) // _LANES
    x3 = x_flat.reshape(B, S, _LANES)

    # Rows per grid step: amortize the ~0.35us/step overhead, but keep the
    # parallel grid length >= 2 (megacore sharding) and the block <= 4 MiB f32.
    row_f32_bytes = S * _LANES * 4
    R = 1
    for r in (16, 8, 4, 2):
        if B % r == 0 and B // r >= 2 and r * row_f32_bytes <= 4 * 1024 * 1024:
            R = r
            break

    block_f32_bytes = R * row_f32_bytes
    # in/out double-buffered in native dtype + in-kernel f32 key/compare temps.
    vmem_limit = int(min(64 * 1024 * 1024,
                         max(32 * 1024 * 1024, 12 * block_f32_bytes)))

    out3 = pl.pallas_call(
        functools.partial(_kwta_kernel, k=k),
        grid=(B // R,),
        in_specs=[pl.BlockSpec((R, S, _LANES), lambda b: (b, 0, 0))],
        out_specs=pl.BlockSpec((R, S, _LANES), lambda b: (b, 0, 0)),
        out_shape=jax.ShapeDtypeStruct((B, S, _LANES), cdtype),
        compiler_params=pltpu.CompilerParams(
            dimension_semantics=("parallel",),
            vmem_limit_bytes=vmem_limit,
        ),
    )(x3)

    out = out3.reshape(B, S * _LANES)[:, :N]
    return out.astype(orig_dtype).reshape(orig_shape)


def _kwta_reference(x, sr):
    """Pure-JAX reference mirroring the PyTorch module."""
    B = x.shape[0]
    N = int(np.prod(x.shape[1:]))
    k = int(sr * N)
    x_flat = x.reshape(B, N)
    # k-th largest = element at index N-k of the ascending sort
    thr = jnp.sort(x_flat, axis=1)[:, N - k]
    comp = (x_flat >= thr[:, None]).astype(x.dtype)
    return (comp * x_flat).reshape(x.shape)


if __name__ == "__main__":
    key = jax.random.PRNGKey(0)
    B, C, H, W = 2, 4, 16, 16          # N = C*H*W = 1024
    sr = 0.2                           # k = int(0.2 * 1024) = 204
    x = jax.random.normal(key, (B, C, H, W), dtype=jnp.float32)

    out = kwta(x, sr)
    out = jax.block_until_ready(out)

    ref = _kwta_reference(x, sr)
    np.testing.assert_allclose(np.asarray(out), np.asarray(ref), rtol=0, atol=0)

    # sanity: exactly k nonzeros per sample (values are continuous -> no ties)
    k_exp = int(sr * C * H * W)
    nnz = np.count_nonzero(np.asarray(out).reshape(B, -1), axis=1)
    assert np.all(nnz == k_exp), (nnz, k_exp)

    print("KERNEL_OK")
</pallas_src>

<mosaic_0001>
module attributes {stable_mosaic.version = 11 : i64} {
  func.func @_kwta_kernel(%arg0: i32, %arg1: memref<1x8x128xf32, #tpu.memory_space<vmem>>, %arg2: memref<1x8x128xf32, #tpu.memory_space<vmem>>) attributes {dimension_semantics = [#tpu.dimension_semantics<parallel>], iteration_bounds = array<i64: 2>, scalar_prefetch = 0 : i64, scratch_operands = 0 : i64, tpu.core_type = #tpu.core_type<tc>, window_params = [{transform_indices = @transform_0, window_bounds = array<i64: 1, 8, 128>}, {transform_indices = @transform_1, window_bounds = array<i64: 1, 8, 128>}]} {
    %c0 = arith.constant 0 : index
    %c0_0 = arith.constant 0 : index
    %c0_1 = arith.constant 0 : index
    %0 = vector.load %arg1[%c0, %c0_0, %c0_1] : memref<1x8x128xf32, #tpu.memory_space<vmem>>, vector<1x8x128xf32>
    %1 = tpu.bitcast %0 : vector<1x8x128xf32> -> vector<1x8x128xi32>
    %c0_i32 = arith.constant 0 : i32
    %2 = vector.broadcast %c0_i32 : i32 to vector<1x8x128xi32>
    %3 = arith.cmpi sge, %1, %2 : vector<1x8x128xi32>
    %c2147483647_i32 = arith.constant 2147483647 : i32
    %4 = vector.broadcast %c2147483647_i32 : i32 to vector<1x8x128xi32>
    %5 = arith.xori %1, %4 : vector<1x8x128xi32>
    %6 = arith.select %3, %1, %5 : vector<1x8x128xi1>, vector<1x8x128xi32>
    %c0_i32_2 = arith.constant 0 : i32
    %7 = vector.broadcast %c0_i32_2 : i32 to vector<1x1x1xi32>
    %c-2147483648_i32 = arith.constant -2147483648 : i32
    %8 = vector.broadcast %c-2147483648_i32 : i32 to vector<1x1x1xi32>
    %9 = vector.broadcast %7 : vector<1x1x1xi32> to vector<1x8x128xi32>
    %10 = arith.cmpi sge, %6, %9 : vector<1x8x128xi32>
    %11 = arith.extui %10 : vector<1x8x128xi1> to vector<1x8x128xi32>
    %cst = arith.constant dense<0> : vector<1x128xi32>
    %12 = vector.multi_reduction <add>, %11, %cst [1] : vector<1x8x128xi32> to vector<1x128xi32>
    %13 = vector.shape_cast %12 : vector<1x128xi32> to vector<1x1x128xi32>
    %cst_3 = arith.constant dense<0> : vector<1x1xi32>
    %14 = vector.multi_reduction <add>, %13, %cst_3 [2] : vector<1x1x128xi32> to vector<1x1xi32>
    %15 = vector.shape_cast %14 : vector<1x1xi32> to vector<1x1x1xi32>
    %c204_i32 = arith.constant 204 : i32
    %16 = vector.broadcast %c204_i32 : i32 to vector<1x1x1xi32>
    %17 = arith.cmpi sge, %15, %16 : vector<1x1x1xi32>
    %18 = arith.select %17, %7, %8 : vector<1x1x1xi1>, vector<1x1x1xi32>
    %19 = arith.addi %18, %7 : vector<1x1x1xi32>
    %c1073741824_i32 = arith.constant 1073741824 : i32
    %20 = vector.broadcast %c1073741824_i32 : i32 to vector<1x1x1xi32>
    %21 = arith.addi %19, %20 : vector<1x1x1xi32>
    %22 = vector.broadcast %21 : vector<1x1x1xi32> to vector<1x8x128xi32>
    %23 = arith.cmpi sge, %6, %22 : vector<1x8x128xi32>
    %24 = arith.extui %23 : vector<1x8x128xi1> to vector<1x8x128xi32>
    %cst_4 = arith.constant dense<0> : vector<1x128xi32>
    %25 = vector.multi_reduction <add>, %24, %cst_4 [1] : vector<1x8x128xi32> to vector<1x128xi32>
    %26 = vector.shape_cast %25 : vector<1x128xi32> to vector<1x1x128xi32>
    %cst_5 = arith.constant dense<0> : vector<1x1xi32>
    %27 = vector.multi_reduction <add>, %26, %cst_5 [2] : vector<1x1x128xi32> to vector<1x1xi32>
    %28 = vector.shape_cast %27 : vector<1x1xi32> to vector<1x1x1xi32>
    %c204_i32_6 = arith.constant 204 : i32
    %29 = vector.broadcast %c204_i32_6 : i32 to vector<1x1x1xi32>
    %30 = arith.cmpi sge, %28, %29 : vector<1x1x1xi32>
    %c1073741824_i32_7 = arith.constant 1073741824 : i32
    %31 = vector.broadcast %c1073741824_i32_7 : i32 to vector<1x1x1xi32>
    %32 = arith.addi %7, %31 : vector<1x1x1xi32>
    %33 = arith.select %30, %32, %7 : vector<1x1x1xi1>, vector<1x1x1xi32>
    %34 = arith.addi %18, %33 : vector<1x1x1xi32>
    %c536870912_i32 = arith.constant 536870912 : i32
    %35 = vector.broadcast %c536870912_i32 : i32 to vector<1x1x1xi32>
    %36 = arith.addi %34, %35 : vector<1x1x1xi32>
    %37 = vector.broadcast %36 : vector<1x1x1xi32> to vector<1x8x128xi32>
    %38 = arith.cmpi sge, %6, %37 : vector<1x8x128xi32>
    %39 = arith.extui %38 : vector<1x8x128xi1> to vector<1x8x128xi32>
    %cst_8 = arith.constant dense<0> : vector<1x128xi32>
    %40 = vector.multi_reduction <add>, %39, %cst_8 [1] : vector<1x8x128xi32> to vector<1x128xi32>
    %41 = vector.shape_cast %40 : vector<1x128xi32> to vector<1x1x128xi32>
    %cst_9 = arith.constant dense<0> : vector<1x1xi32>
    %42 = vector.multi_reduction <add>, %41, %cst_9 [2] : vector<1x1x128xi32> to vector<1x1xi32>
    %43 = vector.shape_cast %42 : vector<1x1xi32> to vector<1x1x1xi32>
    %c204_i32_10 = arith.constant 204 : i32
    %44 = vector.broadcast %c204_i32_10 : i32 to vector<1x1x1xi32>
    %45 = arith.cmpi sge, %43, %44 : vector<1x1x1xi32>
    %c536870912_i32_11 = arith.constant 536870912 : i32
    %46 = vector.broadcast %c536870912_i32_11 : i32 to vector<1x1x1xi32>
    %47 = arith.addi %33, %46 : vector<1x1x1xi32>
    %48 = arith.select %45, %47, %33 : vector<1x1x1xi1>, vector<1x1x1xi32>
    %49 = arith.addi %18, %48 : vector<1x1x1xi32>
    %c268435456_i32 = arith.constant 268435456 : i32
    %50 = vector.broadcast %c268435456_i32 : i32 to vector<1x1x1xi32>
    %51 = arith.addi %49, %50 : vector<1x1x1xi32>
    %52 = vector.broadcast %51 : vector<1x1x1xi32> to vector<1x8x128xi32>
    %53 = arith.cmpi sge, %6, %52 : vector<1x8x128xi32>
    %54 = arith.extui %53 : vector<1x8x128xi1> to vector<1x8x128xi32>
    %cst_12 = arith.constant dense<0> : vector<1x128xi32>
    %55 = vector.multi_reduction <add>, %54, %cst_12 [1] : vector<1x8x128xi32> to vector<1x128xi32>
    %56 = vector.shape_cast %55 : vector<1x128xi32> to vector<1x1x128xi32>
    %cst_13 = arith.constant dense<0> : vector<1x1xi32>
    %57 = vector.multi_reduction <add>, %56, %cst_13 [2] : vector<1x1x128xi32> to vector<1x1xi32>
    %58 = vector.shape_cast %57 : vector<1x1xi32> to vector<1x1x1xi32>
    %c204_i32_14 = arith.constant 204 : i32
    %59 = vector.broadcast %c204_i32_14 : i32 to vector<1x1x1xi32>
    %60 = arith.cmpi sge, %58, %59 : vector<1x1x1xi32>
    %c268435456_i32_15 = arith.constant 268435456 : i32
    %61 = vector.broadcast %c268435456_i32_15 : i32 to vector<1x1x1xi32>
    %62 = arith.addi %48, %61 : vector<1x1x1xi32>
    %63 = arith.select %60, %62, %48 : vector<1x1x1xi1>, vector<1x1x1xi32>
    %64 = arith.addi %18, %63 : vector<1x1x1xi32>
    %c134217728_i32 = arith.constant 134217728 : i32
    %65 = vector.broadcast %c134217728_i32 : i32 to vector<1x1x1xi32>
    %66 = arith.addi %64, %65 : vector<1x1x1xi32>
    %67 = vector.broadcast %66 : vector<1x1x1xi32> to vector<1x8x128xi32>
    %68 = arith.cmpi sge, %6, %67 : vector<1x8x128xi32>
    %69 = arith.extui %68 : vector<1x8x128xi1> to vector<1x8x128xi32>
    %cst_16 = arith.constant dense<0> : vector<1x128xi32>
    %70 = vector.multi_reduction <add>, %69, %cst_16 [1] : vector<1x8x128xi32> to vector<1x128xi32>
    %71 = vector.shape_cast %70 : vector<1x128xi32> to vector<1x1x128xi32>
    %cst_17 = arith.constant dense<0> : vector<1x1xi32>
    %72 = vector.multi_reduction <add>, %71, %cst_17 [2] : vector<1x1x128xi32> to vector<1x1xi32>
    %73 = vector.shape_cast %72 : vector<1x1xi32> to vector<1x1x1xi32>
    %c204_i32_18 = arith.constant 204 : i32
    %74 = vector.broadcast %c204_i32_18 : i32 to vector<1x1x1xi32>
    %75 = arith.cmpi sge, %73, %74 : vector<1x1x1xi32>
    %c134217728_i32_19 = arith.constant 134217728 : i32
    %76 = vector.broadcast %c134217728_i32_19 : i32 to vector<1x1x1xi32>
    %77 = arith.addi %63, %76 : vector<1x1x1xi32>
    %78 = arith.select %75, %77, %63 : vector<1x1x1xi1>, vector<1x1x1xi32>
    %79 = arith.addi %18, %78 : vector<1x1x1xi32>
    %c67108864_i32 = arith.constant 67108864 : i32
    %80 = vector.broadcast %c67108864_i32 : i32 to vector<1x1x1xi32>
    %81 = arith.addi %79, %80 : vector<1x1x1xi32>
    %82 = vector.broadcast %81 : vector<1x1x1xi32> to vector<1x8x128xi32>
    %83 = arith.cmpi sge, %6, %82 : vector<1x8x128xi32>
    %84 = arith.extui %83 : vector<1x8x128xi1> to vector<1x8x128xi32>
    %cst_20 = arith.constant dense<0> : vector<1x128xi32>
    %85 = vector.multi_reduction <add>, %84, %cst_20 [1] : vector<1x8x128xi32> to vector<1x128xi32>
    %86 = vector.shape_cast %85 : vector<1x128xi32> to vector<1x1x128xi32>
    %cst_21 = arith.constant dense<0> : vector<1x1xi32>
    %87 = vector.multi_reduction <add>, %86, %cst_21 [2] : vector<1x1x128xi32> to vector<1x1xi32>
    %88 = vector.shape_cast %87 : vector<1x1xi32> to vector<1x1x1xi32>
    %c204_i32_22 = arith.constant 204 : i32
    %89 = vector.broadcast %c204_i32_22 : i32 to vector<1x1x1xi32>
    %90 = arith.cmpi sge, %88, %89 : vector<1x1x1xi32>
    %c67108864_i32_23 = arith.constant 67108864 : i32
    %91 = vector.broadcast %c67108864_i32_23 : i32 to vector<1x1x1xi32>
    %92 = arith.addi %78, %91 : vector<1x1x1xi32>
    %93 = arith.select %90, %92, %78 : vector<1x1x1xi1>, vector<1x1x1xi32>
    %94 = arith.addi %18, %93 : vector<1x1x1xi32>
    %c33554432_i32 = arith.constant 33554432 : i32
    %95 = vector.broadcast %c33554432_i32 : i32 to vector<1x1x1xi32>
    %96 = arith.addi %94, %95 : vector<1x1x1xi32>
    %97 = vector.broadcast %96 : vector<1x1x1xi32> to vector<1x8x128xi32>
    %98 = arith.cmpi sge, %6, %97 : vector<1x8x128xi32>
    %99 = arith.extui %98 : vector<1x8x128xi1> to vector<1x8x128xi32>
    %cst_24 = arith.constant dense<0> : vector<1x128xi32>
    %100 = vector.multi_reduction <add>, %99, %cst_24 [1] : vector<1x8x128xi32> to vector<1x128xi32>
    %101 = vector.shape_cast %100 : vector<1x128xi32> to vector<1x1x128xi32>
    %cst_25 = arith.constant dense<0> : vector<1x1xi32>
    %102 = vector.multi_reduction <add>, %101, %cst_25 [2] : vector<1x1x128xi32> to vector<1x1xi32>
    %103 = vector.shape_cast %102 : vector<1x1xi32> to vector<1x1x1xi32>
    %c204_i32_26 = arith.constant 204 : i32
    %104 = vector.broadcast %c204_i32_26 : i32 to vector<1x1x1xi32>
    %105 = arith.cmpi sge, %103, %104 : vector<1x1x1xi32>
    %c33554432_i32_27 = arith.constant 33554432 : i32
    %106 = vector.broadcast %c33554432_i32_27 : i32 to vector<1x1x1xi32>
    %107 = arith.addi %93, %106 : vector<1x1x1xi32>
    %108 = arith.select %105, %107, %93 : vector<1x1x1xi1>, vector<1x1x1xi32>
    %109 = arith.addi %18, %108 : vector<1x1x1xi32>
    %c16777216_i32 = arith.constant 16777216 : i32
    %110 = vector.broadcast %c16777216_i32 : i32 to vector<1x1x1xi32>
    %111 = arith.addi %109, %110 : vector<1x1x1xi32>
    %112 = vector.broadcast %111 : vector<1x1x1xi32> to vector<1x8x128xi32>
    %113 = arith.cmpi sge, %6, %112 : vector<1x8x128xi32>
    %114 = arith.extui %113 : vector<1x8x128xi1> to vector<1x8x128xi32>
    %cst_28 = arith.constant dense<0> : vector<1x128xi32>
    %115 = vector.multi_reduction <add>, %114, %cst_28 [1] : vector<1x8x128xi32> to vector<1x128xi32>
    %116 = vector.shape_cast %115 : vector<1x128xi32> to vector<1x1x128xi32>
    %cst_29 = arith.constant dense<0> : vector<1x1xi32>
    %117 = vector.multi_reduction <add>, %116, %cst_29 [2] : vector<1x1x128xi32> to vector<1x1xi32>
    %118 = vector.shape_cast %117 : vector<1x1xi32> to vector<1x1x1xi32>
    %c204_i32_30 = arith.constant 204 : i32
    %119 = vector.broadcast %c204_i32_30 : i32 to vector<1x1x1xi32>
    %120 = arith.cmpi sge, %118, %119 : vector<1x1x1xi32>
    %c16777216_i32_31 = arith.constant 16777216 : i32
    %121 = vector.broadcast %c16777216_i32_31 : i32 to vector<1x1x1xi32>
    %122 = arith.addi %108, %121 : vector<1x1x1xi32>
    %123 = arith.select %120, %122, %108 : vector<1x1x1xi1>, vector<1x1x1xi32>
    %124 = arith.addi %18, %123 : vector<1x1x1xi32>
    %c8388608_i32 = arith.constant 8388608 : i32
    %125 = vector.broadcast %c8388608_i32 : i32 to vector<1x1x1xi32>
    %126 = arith.addi %124, %125 : vector<1x1x1xi32>
    %127 = vector.broadcast %126 : vector<1x1x1xi32> to vector<1x8x128xi32>
    %128 = arith.cmpi sge, %6, %127 : vector<1x8x128xi32>
    %129 = arith.extui %128 : vector<1x8x128xi1> to vector<1x8x128xi32>
    %cst_32 = arith.constant dense<0> : vector<1x128xi32>
    %130 = vector.multi_reduction <add>, %129, %cst_32 [1] : vector<1x8x128xi32> to vector<1x128xi32>
    %131 = vector.shape_cast %130 : vector<1x128xi32> to vector<1x1x128xi32>
    %cst_33 = arith.constant dense<0> : vector<1x1xi32>
    %132 = vector.multi_reduction <add>, %131, %cst_33 [2] : vector<1x1x128xi32> to vector<1x1xi32>
    %133 = vector.shape_cast %132 : vector<1x1xi32> to vector<1x1x1xi32>
    %c204_i32_34 = arith.constant 204 : i32
    %134 = vector.broadcast %c204_i32_34 : i32 to vector<1x1x1xi32>
    %135 = arith.cmpi sge, %133, %134 : vector<1x1x1xi32>
    %c8388608_i32_35 = arith.constant 8388608 : i32
    %136 = vector.broadcast %c8388608_i32_35 : i32 to vector<1x1x1xi32>
    %137 = arith.addi %123, %136 : vector<1x1x1xi32>
    %138 = arith.select %135, %137, %123 : vector<1x1x1xi1>, vector<1x1x1xi32>
    %139 = arith.addi %18, %138 : vector<1x1x1xi32>
    %c4194304_i32 = arith.constant 4194304 : i32
    %140 = vector.broadcast %c4194304_i32 : i32 to vector<1x1x1xi32>
    %141 = arith.addi %139, %140 : vector<1x1x1xi32>
    %142 = vector.broadcast %141 : vector<1x1x1xi32> to vector<1x8x128xi32>
    %143 = arith.cmpi sge, %6, %142 : vector<1x8x128xi32>
    %144 = arith.extui %143 : vector<1x8x128xi1> to vector<1x8x128xi32>
    %cst_36 = arith.constant dense<0> : vector<1x128xi32>
    %145 = vector.multi_reduction <add>, %144, %cst_36 [1] : vector<1x8x128xi32> to vector<1x128xi32>
    %146 = vector.shape_cast %145 : vector<1x128xi32> to vector<1x1x128xi32>
    %cst_37 = arith.constant dense<0> : vector<1x1xi32>
    %147 = vector.multi_reduction <add>, %146, %cst_37 [2] : vector<1x1x128xi32> to vector<1x1xi32>
    %148 = vector.shape_cast %147 : vector<1x1xi32> to vector<1x1x1xi32>
    %c204_i32_38 = arith.constant 204 : i32
    %149 = vector.broadcast %c204_i32_38 : i32 to vector<1x1x1xi32>
    %150 = arith.cmpi sge, %148, %149 : vector<1x1x1xi32>
    %c4194304_i32_39 = arith.constant 4194304 : i32
    %151 = vector.broadcast %c4194304_i32_39 : i32 to vector<1x1x1xi32>
    %152 = arith.addi %138, %151 : vector<1x1x1xi32>
    %153 = arith.select %150, %152, %138 : vector<1x1x1xi1>, vector<1x1x1xi32>
    %154 = arith.addi %18, %153 : vector<1x1x1xi32>
    %c2097152_i32 = arith.constant 2097152 : i32
    %155 = vector.broadcast %c2097152_i32 : i32 to vector<1x1x1xi32>
    %156 = arith.addi %154, %155 : vector<1x1x1xi32>
    %157 = vector.broadcast %156 : vector<1x1x1xi32> to vector<1x8x128xi32>
    %158 = arith.cmpi sge, %6, %157 : vector<1x8x128xi32>
    %159 = arith.extui %158 : vector<1x8x128xi1> to vector<1x8x128xi32>
    %cst_40 = arith.constant dense<0> : vector<1x128xi32>
    %160 = vector.multi_reduction <add>, %159, %cst_40 [1] : vector<1x8x128xi32> to vector<1x128xi32>
    %161 = vector.shape_cast %160 : vector<1x128xi32> to vector<1x1x128xi32>
    %cst_41 = arith.constant dense<0> : vector<1x1xi32>
    %162 = vector.multi_reduction <add>, %161, %cst_41 [2] : vector<1x1x128xi32> to vector<1x1xi32>
    %163 = vector.shape_cast %162 : vector<1x1xi32> to vector<1x1x1xi32>
    %c204_i32_42 = arith.constant 204 : i32
    %164 = vector.broadcast %c204_i32_42 : i32 to vector<1x1x1xi32>
    %165 = arith.cmpi sge, %163, %164 : vector<1x1x1xi32>
    %c2097152_i32_43 = arith.constant 2097152 : i32
    %166 = vector.broadcast %c2097152_i32_43 : i32 to vector<1x1x1xi32>
    %167 = arith.addi %153, %166 : vector<1x1x1xi32>
    %168 = arith.select %165, %167, %153 : vector<1x1x1xi1>, vector<1x1x1xi32>
    %169 = arith.addi %18, %168 : vector<1x1x1xi32>
    %c1048576_i32 = arith.constant 1048576 : i32
    %170 = vector.broadcast %c1048576_i32 : i32 to vector<1x1x1xi32>
    %171 = arith.addi %169, %170 : vector<1x1x1xi32>
    %172 = vector.broadcast %171 : vector<1x1x1xi32> to vector<1x8x128xi32>
    %173 = arith.cmpi sge, %6, %172 : vector<1x8x128xi32>
    %174 = arith.extui %173 : vector<1x8x128xi1> to vector<1x8x128xi32>
    %cst_44 = arith.constant dense<0> : vector<1x128xi32>
    %175 = vector.multi_reduction <add>, %174, %cst_44 [1] : vector<1x8x128xi32> to vector<1x128xi32>
    %176 = vector.shape_cast %175 : vector<1x128xi32> to vector<1x1x128xi32>
    %cst_45 = arith.constant dense<0> : vector<1x1xi32>
    %177 = vector.multi_reduction <add>, %176, %cst_45 [2] : vector<1x1x128xi32> to vector<1x1xi32>
    %178 = vector.shape_cast %177 : vector<1x1xi32> to vector<1x1x1xi32>
    %c204_i32_46 = arith.constant 204 : i32
    %179 = vector.broadcast %c204_i32_46 : i32 to vector<1x1x1xi32>
    %180 = arith.cmpi sge, %178, %179 : vector<1x1x1xi32>
    %c1048576_i32_47 = arith.constant 1048576 : i32
    %181 = vector.broadcast %c1048576_i32_47 : i32 to vector<1x1x1xi32>
    %182 = arith.addi %168, %181 : vector<1x1x1xi32>
    %183 = arith.select %180, %182, %168 : vector<1x1x1xi1>, vector<1x1x1xi32>
    %184 = arith.addi %18, %183 : vector<1x1x1xi32>
    %c524288_i32 = arith.constant 524288 : i32
    %185 = vector.broadcast %c524288_i32 : i32 to vector<1x1x1xi32>
    %186 = arith.addi %184, %185 : vector<1x1x1xi32>
    %187 = vector.broadcast %186 : vector<1x1x1xi32> to vector<1x8x128xi32>
    %188 = arith.cmpi sge, %6, %187 : vector<1x8x128xi32>
    %189 = arith.extui %188 : vector<1x8x128xi1> to vector<1x8x128xi32>
    %cst_48 = arith.constant dense<0> : vector<1x128xi32>
    %190 = vector.multi_reduction <add>, %189, %cst_48 [1] : vector<1x8x128xi32> to vector<1x128xi32>
    %191 = vector.shape_cast %190 : vector<1x128xi32> to vector<1x1x128xi32>
    %cst_49 = arith.constant dense<0> : vector<1x1xi32>
    %192 = vector.multi_reduction <add>, %191, %cst_49 [2] : vector<1x1x128xi32> to vector<1x1xi32>
    %193 = vector.shape_cast %192 : vector<1x1xi32> to vector<1x1x1xi32>
    %c204_i32_50 = arith.constant 204 : i32
    %194 = vector.broadcast %c204_i32_50 : i32 to vector<1x1x1xi32>
    %195 = arith.cmpi sge, %193, %194 : vector<1x1x1xi32>
    %c524288_i32_51 = arith.constant 524288 : i32
    %196 = vector.broadcast %c524288_i32_51 : i32 to vector<1x1x1xi32>
    %197 = arith.addi %183, %196 : vector<1x1x1xi32>
    %198 = arith.select %195, %197, %183 : vector<1x1x1xi1>, vector<1x1x1xi32>
    %199 = arith.addi %18, %198 : vector<1x1x1xi32>
    %c262144_i32 = arith.constant 262144 : i32
    %200 = vector.broadcast %c262144_i32 : i32 to vector<1x1x1xi32>
    %201 = arith.addi %199, %200 : vector<1x1x1xi32>
    %202 = vector.broadcast %201 : vector<1x1x1xi32> to vector<1x8x128xi32>
    %203 = arith.cmpi sge, %6, %202 : vector<1x8x128xi32>
    %204 = arith.extui %203 : vector<1x8x128xi1> to vector<1x8x128xi32>
    %cst_52 = arith.constant dense<0> : vector<1x128xi32>
    %205 = vector.multi_reduction <add>, %204, %cst_52 [1] : vector<1x8x128xi32> to vector<1x128xi32>
    %206 = vector.shape_cast %205 : vector<1x128xi32> to vector<1x1x128xi32>
    %cst_53 = arith.constant dense<0> : vector<1x1xi32>
    %207 = vector.multi_reduction <add>, %206, %cst_53 [2] : vector<1x1x128xi32> to vector<1x1xi32>
    %208 = vector.shape_cast %207 : vector<1x1xi32> to vector<1x1x1xi32>
    %c204_i32_54 = arith.constant 204 : i32
    %209 = vector.broadcast %c204_i32_54 : i32 to vector<1x1x1xi32>
    %210 = arith.cmpi sge, %208, %209 : vector<1x1x1xi32>
    %c262144_i32_55 = arith.constant 262144 : i32
    %211 = vector.broadcast %c262144_i32_55 : i32 to vector<1x1x1xi32>
    %212 = arith.addi %198, %211 : vector<1x1x1xi32>
    %213 = arith.select %210, %212, %198 : vector<1x1x1xi1>, vector<1x1x1xi32>
    %214 = arith.addi %18, %213 : vector<1x1x1xi32>
    %c131072_i32 = arith.constant 131072 : i32
    %215 = vector.broadcast %c131072_i32 : i32 to vector<1x1x1xi32>
    %216 = arith.addi %214, %215 : vector<1x1x1xi32>
    %217 = vector.broadcast %216 : vector<1x1x1xi32> to vector<1x8x128xi32>
    %218 = arith.cmpi sge, %6, %217 : vector<1x8x128xi32>
    %219 = arith.extui %218 : vector<1x8x128xi1> to vector<1x8x128xi32>
    %cst_56 = arith.constant dense<0> : vector<1x128xi32>
    %220 = vector.multi_reduction <add>, %219, %cst_56 [1] : vector<1x8x128xi32> to vector<1x128xi32>
    %221 = vector.shape_cast %220 : vector<1x128xi32> to vector<1x1x128xi32>
    %cst_57 = arith.constant dense<0> : vector<1x1xi32>
    %222 = vector.multi_reduction <add>, %221, %cst_57 [2] : vector<1x1x128xi32> to vector<1x1xi32>
    %223 = vector.shape_cast %222 : vector<1x1xi32> to vector<1x1x1xi32>
    %c204_i32_58 = arith.constant 204 : i32
    %224 = vector.broadcast %c204_i32_58 : i32 to vector<1x1x1xi32>
    %225 = arith.cmpi sge, %223, %224 : vector<1x1x1xi32>
    %c131072_i32_59 = arith.constant 131072 : i32
    %226 = vector.broadcast %c131072_i32_59 : i32 to vector<1x1x1xi32>
    %227 = arith.addi %213, %226 : vector<1x1x1xi32>
    %228 = arith.select %225, %227, %213 : vector<1x1x1xi1>, vector<1x1x1xi32>
    %229 = arith.addi %18, %228 : vector<1x1x1xi32>
    %c65536_i32 = arith.constant 65536 : i32
    %230 = vector.broadcast %c65536_i32 : i32 to vector<1x1x1xi32>
    %231 = arith.addi %229, %230 : vector<1x1x1xi32>
    %232 = vector.broadcast %231 : vector<1x1x1xi32> to vector<1x8x128xi32>
    %233 = arith.cmpi sge, %6, %232 : vector<1x8x128xi32>
    %234 = arith.extui %233 : vector<1x8x128xi1> to vector<1x8x128xi32>
    %cst_60 = arith.constant dense<0> : vector<1x128xi32>
    %235 = vector.multi_reduction <add>, %234, %cst_60 [1] : vector<1x8x128xi32> to vector<1x128xi32>
    %236 = vector.shape_cast %235 : vector<1x128xi32> to vector<1x1x128xi32>
    %cst_61 = arith.constant dense<0> : vector<1x1xi32>
    %237 = vector.multi_reduction <add>, %236, %cst_61 [2] : vector<1x1x128xi32> to vector<1x1xi32>
    %238 = vector.shape_cast %237 : vector<1x1xi32> to vector<1x1x1xi32>
    %c204_i32_62 = arith.constant 204 : i32
    %239 = vector.broadcast %c204_i32_62 : i32 to vector<1x1x1xi32>
    %240 = arith.cmpi sge, %238, %239 : vector<1x1x1xi32>
    %c65536_i32_63 = arith.constant 65536 : i32
    %241 = vector.broadcast %c65536_i32_63 : i32 to vector<1x1x1xi32>
    %242 = arith.addi %228, %241 : vector<1x1x1xi32>
    %243 = arith.select %240, %242, %228 : vector<1x1x1xi1>, vector<1x1x1xi32>
    %244 = arith.addi %18, %243 : vector<1x1x1xi32>
    %c32768_i32 = arith.constant 32768 : i32
    %245 = vector.broadcast %c32768_i32 : i32 to vector<1x1x1xi32>
    %246 = arith.addi %244, %245 : vector<1x1x1xi32>
    %247 = vector.broadcast %246 : vector<1x1x1xi32> to vector<1x8x128xi32>
    %248 = arith.cmpi sge, %6, %247 : vector<1x8x128xi32>
    %249 = arith.extui %248 : vector<1x8x128xi1> to vector<1x8x128xi32>
    %cst_64 = arith.constant dense<0> : vector<1x128xi32>
    %250 = vector.multi_reduction <add>, %249, %cst_64 [1] : vector<1x8x128xi32> to vector<1x128xi32>
    %251 = vector.shape_cast %250 : vector<1x128xi32> to vector<1x1x128xi32>
    %cst_65 = arith.constant dense<0> : vector<1x1xi32>
    %252 = vector.multi_reduction <add>, %251, %cst_65 [2] : vector<1x1x128xi32> to vector<1x1xi32>
    %253 = vector.shape_cast %252 : vector<1x1xi32> to vector<1x1x1xi32>
    %c204_i32_66 = arith.constant 204 : i32
    %254 = vector.broadcast %c204_i32_66 : i32 to vector<1x1x1xi32>
    %255 = arith.cmpi sge, %253, %254 : vector<1x1x1xi32>
    %c32768_i32_67 = arith.constant 32768 : i32
    %256 = vector.broadcast %c32768_i32_67 : i32 to vector<1x1x1xi32>
    %257 = arith.addi %243, %256 : vector<1x1x1xi32>
    %258 = arith.select %255, %257, %243 : vector<1x1x1xi1>, vector<1x1x1xi32>
    %259 = arith.addi %18, %258 : vector<1x1x1xi32>
    %c16384_i32 = arith.constant 16384 : i32
    %260 = vector.broadcast %c16384_i32 : i32 to vector<1x1x1xi32>
    %261 = arith.addi %259, %260 : vector<1x1x1xi32>
    %262 = vector.broadcast %261 : vector<1x1x1xi32> to vector<1x8x128xi32>
    %263 = arith.cmpi sge, %6, %262 : vector<1x8x128xi32>
    %264 = arith.extui %263 : vector<1x8x128xi1> to vector<1x8x128xi32>
    %cst_68 = arith.constant dense<0> : vector<1x128xi32>
    %265 = vector.multi_reduction <add>, %264, %cst_68 [1] : vector<1x8x128xi32> to vector<1x128xi32>
    %266 = vector.shape_cast %265 : vector<1x128xi32> to vector<1x1x128xi32>
    %cst_69 = arith.constant dense<0> : vector<1x1xi32>
    %267 = vector.multi_reduction <add>, %266, %cst_69 [2] : vector<1x1x128xi32> to vector<1x1xi32>
    %268 = vector.shape_cast %267 : vector<1x1xi32> to vector<1x1x1xi32>
    %c204_i32_70 = arith.constant 204 : i32
    %269 = vector.broadcast %c204_i32_70 : i32 to vector<1x1x1xi32>
    %270 = arith.cmpi sge, %268, %269 : vector<1x1x1xi32>
    %c16384_i32_71 = arith.constant 16384 : i32
    %271 = vector.broadcast %c16384_i32_71 : i32 to vector<1x1x1xi32>
    %272 = arith.addi %258, %271 : vector<1x1x1xi32>
    %273 = arith.select %270, %272, %258 : vector<1x1x1xi1>, vector<1x1x1xi32>
    %274 = arith.addi %18, %273 : vector<1x1x1xi32>
    %c8192_i32 = arith.constant 8192 : i32
    %275 = vector.broadcast %c8192_i32 : i32 to vector<1x1x1xi32>
    %276 = arith.addi %274, %275 : vector<1x1x1xi32>
    %277 = vector.broadcast %276 : vector<1x1x1xi32> to vector<1x8x128xi32>
    %278 = arith.cmpi sge, %6, %277 : vector<1x8x128xi32>
    %279 = arith.extui %278 : vector<1x8x128xi1> to vector<1x8x128xi32>
    %cst_72 = arith.constant dense<0> : vector<1x128xi32>
    %280 = vector.multi_reduction <add>, %279, %cst_72 [1] : vector<1x8x128xi32> to vector<1x128xi32>
    %281 = vector.shape_cast %280 : vector<1x128xi32> to vector<1x1x128xi32>
    %cst_73 = arith.constant dense<0> : vector<1x1xi32>
    %282 = vector.multi_reduction <add>, %281, %cst_73 [2] : vector<1x1x128xi32> to vector<1x1xi32>
    %283 = vector.shape_cast %282 : vector<1x1xi32> to vector<1x1x1xi32>
    %c204_i32_74 = arith.constant 204 : i32
    %284 = vector.broadcast %c204_i32_74 : i32 to vector<1x1x1xi32>
    %285 = arith.cmpi sge, %283, %284 : vector<1x1x1xi32>
    %c8192_i32_75 = arith.constant 8192 : i32
    %286 = vector.broadcast %c8192_i32_75 : i32 to vector<1x1x1xi32>
    %287 = arith.addi %273, %286 : vector<1x1x1xi32>
    %288 = arith.select %285, %287, %273 : vector<1x1x1xi1>, vector<1x1x1xi32>
    %289 = arith.addi %18, %288 : vector<1x1x1xi32>
    %c4096_i32 = arith.constant 4096 : i32
    %290 = vector.broadcast %c4096_i32 : i32 to vector<1x1x1xi32>
    %291 = arith.addi %289, %290 : vector<1x1x1xi32>
    %292 = vector.broadcast %291 : vector<1x1x1xi32> to vector<1x8x128xi32>
    %293 = arith.cmpi sge, %6, %292 : vector<1x8x128xi32>
    %294 = arith.extui %293 : vector<1x8x128xi1> to vector<1x8x128xi32>
    %cst_76 = arith.constant dense<0> : vector<1x128xi32>
    %295 = vector.multi_reduction <add>, %294, %cst_76 [1] : vector<1x8x128xi32> to vector<1x128xi32>
    %296 = vector.shape_cast %295 : vector<1x128xi32> to vector<1x1x128xi32>
    %cst_77 = arith.constant dense<0> : vector<1x1xi32>
    %297 = vector.multi_reduction <add>, %296, %cst_77 [2] : vector<1x1x128xi32> to vector<1x1xi32>
    %298 = vector.shape_cast %297 : vector<1x1xi32> to vector<1x1x1xi32>
    %c204_i32_78 = arith.constant 204 : i32
    %299 = vector.broadcast %c204_i32_78 : i32 to vector<1x1x1xi32>
    %300 = arith.cmpi sge, %298, %299 : vector<1x1x1xi32>
    %c4096_i32_79 = arith.constant 4096 : i32
    %301 = vector.broadcast %c4096_i32_79 : i32 to vector<1x1x1xi32>
    %302 = arith.addi %288, %301 : vector<1x1x1xi32>
    %303 = arith.select %300, %302, %288 : vector<1x1x1xi1>, vector<1x1x1xi32>
    %304 = arith.addi %18, %303 : vector<1x1x1xi32>
    %c2048_i32 = arith.constant 2048 : i32
    %305 = vector.broadcast %c2048_i32 : i32 to vector<1x1x1xi32>
    %306 = arith.addi %304, %305 : vector<1x1x1xi32>
    %307 = vector.broadcast %306 : vector<1x1x1xi32> to vector<1x8x128xi32>
    %308 = arith.cmpi sge, %6, %307 : vector<1x8x128xi32>
    %309 = arith.extui %308 : vector<1x8x128xi1> to vector<1x8x128xi32>
    %cst_80 = arith.constant dense<0> : vector<1x128xi32>
    %310 = vector.multi_reduction <add>, %309, %cst_80 [1] : vector<1x8x128xi32> to vector<1x128xi32>
    %311 = vector.shape_cast %310 : vector<1x128xi32> to vector<1x1x128xi32>
    %cst_81 = arith.constant dense<0> : vector<1x1xi32>
    %312 = vector.multi_reduction <add>, %311, %cst_81 [2] : vector<1x1x128xi32> to vector<1x1xi32>
    %313 = vector.shape_cast %312 : vector<1x1xi32> to vector<1x1x1xi32>
    %c204_i32_82 = arith.constant 204 : i32
    %314 = vector.broadcast %c204_i32_82 : i32 to vector<1x1x1xi32>
    %315 = arith.cmpi sge, %313, %314 : vector<1x1x1xi32>
    %c2048_i32_83 = arith.constant 2048 : i32
    %316 = vector.broadcast %c2048_i32_83 : i32 to vector<1x1x1xi32>
    %317 = arith.addi %303, %316 : vector<1x1x1xi32>
    %318 = arith.select %315, %317, %303 : vector<1x1x1xi1>, vector<1x1x1xi32>
    %319 = arith.addi %18, %318 : vector<1x1x1xi32>
    %c1024_i32 = arith.constant 1024 : i32
    %320 = vector.broadcast %c1024_i32 : i32 to vector<1x1x1xi32>
    %321 = arith.addi %319, %320 : vector<1x1x1xi32>
    %322 = vector.broadcast %321 : vector<1x1x1xi32> to vector<1x8x128xi32>
    %323 = arith.cmpi sge, %6, %322 : vector<1x8x128xi32>
    %324 = arith.extui %323 : vector<1x8x128xi1> to vector<1x8x128xi32>
    %cst_84 = arith.constant dense<0> : vector<1x128xi32>
    %325 = vector.multi_reduction <add>, %324, %cst_84 [1] : vector<1x8x128xi32> to vector<1x128xi32>
    %326 = vector.shape_cast %325 : vector<1x128xi32> to vector<1x1x128xi32>
    %cst_85 = arith.constant dense<0> : vector<1x1xi32>
    %327 = vector.multi_reduction <add>, %326, %cst_85 [2] : vector<1x1x128xi32> to vector<1x1xi32>
    %328 = vector.shape_cast %327 : vector<1x1xi32> to vector<1x1x1xi32>
    %c204_i32_86 = arith.constant 204 : i32
    %329 = vector.broadcast %c204_i32_86 : i32 to vector<1x1x1xi32>
    %330 = arith.cmpi sge, %328, %329 : vector<1x1x1xi32>
    %c1024_i32_87 = arith.constant 1024 : i32
    %331 = vector.broadcast %c1024_i32_87 : i32 to vector<1x1x1xi32>
    %332 = arith.addi %318, %331 : vector<1x1x1xi32>
    %333 = arith.select %330, %332, %318 : vector<1x1x1xi1>, vector<1x1x1xi32>
    %334 = arith.addi %18, %333 : vector<1x1x1xi32>
    %c512_i32 = arith.constant 512 : i32
    %335 = vector.broadcast %c512_i32 : i32 to vector<1x1x1xi32>
    %336 = arith.addi %334, %335 : vector<1x1x1xi32>
    %337 = vector.broadcast %336 : vector<1x1x1xi32> to vector<1x8x128xi32>
    %338 = arith.cmpi sge, %6, %337 : vector<1x8x128xi32>
    %339 = arith.extui %338 : vector<1x8x128xi1> to vector<1x8x128xi32>
    %cst_88 = arith.constant dense<0> : vector<1x128xi32>
    %340 = vector.multi_reduction <add>, %339, %cst_88 [1] : vector<1x8x128xi32> to vector<1x128xi32>
    %341 = vector.shape_cast %340 : vector<1x128xi32> to vector<1x1x128xi32>
    %cst_89 = arith.constant dense<0> : vector<1x1xi32>
    %342 = vector.multi_reduction <add>, %341, %cst_89 [2] : vector<1x1x128xi32> to vector<1x1xi32>
    %343 = vector.shape_cast %342 : vector<1x1xi32> to vector<1x1x1xi32>
    %c204_i32_90 = arith.constant 204 : i32
    %344 = vector.broadcast %c204_i32_90 : i32 to vector<1x1x1xi32>
    %345 = arith.cmpi sge, %343, %344 : vector<1x1x1xi32>
    %c512_i32_91 = arith.constant 512 : i32
    %346 = vector.broadcast %c512_i32_91 : i32 to vector<1x1x1xi32>
    %347 = arith.addi %333, %346 : vector<1x1x1xi32>
    %348 = arith.select %345, %347, %333 : vector<1x1x1xi1>, vector<1x1x1xi32>
    %349 = arith.addi %18, %348 : vector<1x1x1xi32>
    %c256_i32 = arith.constant 256 : i32
    %350 = vector.broadcast %c256_i32 : i32 to vector<1x1x1xi32>
    %351 = arith.addi %349, %350 : vector<1x1x1xi32>
    %352 = vector.broadcast %351 : vector<1x1x1xi32> to vector<1x8x128xi32>
    %353 = arith.cmpi sge, %6, %352 : vector<1x8x128xi32>
    %354 = arith.extui %353 : vector<1x8x128xi1> to vector<1x8x128xi32>
    %cst_92 = arith.constant dense<0> : vector<1x128xi32>
    %355 = vector.multi_reduction <add>, %354, %cst_92 [1] : vector<1x8x128xi32> to vector<1x128xi32>
    %356 = vector.shape_cast %355 : vector<1x128xi32> to vector<1x1x128xi32>
    %cst_93 = arith.constant dense<0> : vector<1x1xi32>
    %357 = vector.multi_reduction <add>, %356, %cst_93 [2] : vector<1x1x128xi32> to vector<1x1xi32>
    %358 = vector.shape_cast %357 : vector<1x1xi32> to vector<1x1x1xi32>
    %c204_i32_94 = arith.constant 204 : i32
    %359 = vector.broadcast %c204_i32_94 : i32 to vector<1x1x1xi32>
    %360 = arith.cmpi sge, %358, %359 : vector<1x1x1xi32>
    %c256_i32_95 = arith.constant 256 : i32
    %361 = vector.broadcast %c256_i32_95 : i32 to vector<1x1x1xi32>
    %362 = arith.addi %348, %361 : vector<1x1x1xi32>
    %363 = arith.select %360, %362, %348 : vector<1x1x1xi1>, vector<1x1x1xi32>
    %364 = arith.addi %18, %363 : vector<1x1x1xi32>
    %c128_i32 = arith.constant 128 : i32
    %365 = vector.broadcast %c128_i32 : i32 to vector<1x1x1xi32>
    %366 = arith.addi %364, %365 : vector<1x1x1xi32>
    %367 = vector.broadcast %366 : vector<1x1x1xi32> to vector<1x8x128xi32>
    %368 = arith.cmpi sge, %6, %367 : vector<1x8x128xi32>
    %369 = arith.extui %368 : vector<1x8x128xi1> to vector<1x8x128xi32>
    %cst_96 = arith.constant dense<0> : vector<1x128xi32>
    %370 = vector.multi_reduction <add>, %369, %cst_96 [1] : vector<1x8x128xi32> to vector<1x128xi32>
    %371 = vector.shape_cast %370 : vector<1x128xi32> to vector<1x1x128xi32>
    %cst_97 = arith.constant dense<0> : vector<1x1xi32>
    %372 = vector.multi_reduction <add>, %371, %cst_97 [2] : vector<1x1x128xi32> to vector<1x1xi32>
    %373 = vector.shape_cast %372 : vector<1x1xi32> to vector<1x1x1xi32>
    %c204_i32_98 = arith.constant 204 : i32
    %374 = vector.broadcast %c204_i32_98 : i32 to vector<1x1x1xi32>
    %375 = arith.cmpi sge, %373, %374 : vector<1x1x1xi32>
    %c128_i32_99 = arith.constant 128 : i32
    %376 = vector.broadcast %c128_i32_99 : i32 to vector<1x1x1xi32>
    %377 = arith.addi %363, %376 : vector<1x1x1xi32>
    %378 = arith.select %375, %377, %363 : vector<1x1x1xi1>, vector<1x1x1xi32>
    %379 = arith.addi %18, %378 : vector<1x1x1xi32>
    %c64_i32 = arith.constant 64 : i32
    %380 = vector.broadcast %c64_i32 : i32 to vector<1x1x1xi32>
    %381 = arith.addi %379, %380 : vector<1x1x1xi32>
    %382 = vector.broadcast %381 : vector<1x1x1xi32> to vector<1x8x128xi32>
    %383 = arith.cmpi sge, %6, %382 : vector<1x8x128xi32>
    %384 = arith.extui %383 : vector<1x8x128xi1> to vector<1x8x128xi32>
    %cst_100 = arith.constant dense<0> : vector<1x128xi32>
    %385 = vector.multi_reduction <add>, %384, %cst_100 [1] : vector<1x8x128xi32> to vector<1x128xi32>
    %386 = vector.shape_cast %385 : vector<1x128xi32> to vector<1x1x128xi32>
    %cst_101 = arith.constant dense<0> : vector<1x1xi32>
    %387 = vector.multi_reduction <add>, %386, %cst_101 [2] : vector<1x1x128xi32> to vector<1x1xi32>
    %388 = vector.shape_cast %387 : vector<1x1xi32> to vector<1x1x1xi32>
    %c204_i32_102 = arith.constant 204 : i32
    %389 = vector.broadcast %c204_i32_102 : i32 to vector<1x1x1xi32>
    %390 = arith.cmpi sge, %388, %389 : vector<1x1x1xi32>
    %c64_i32_103 = arith.constant 64 : i32
    %391 = vector.broadcast %c64_i32_103 : i32 to vector<1x1x1xi32>
    %392 = arith.addi %378, %391 : vector<1x1x1xi32>
    %393 = arith.select %390, %392, %378 : vector<1x1x1xi1>, vector<1x1x1xi32>
    %394 = arith.addi %18, %393 : vector<1x1x1xi32>
    %c32_i32 = arith.constant 32 : i32
    %395 = vector.broadcast %c32_i32 : i32 to vector<1x1x1xi32>
    %396 = arith.addi %394, %395 : vector<1x1x1xi32>
    %397 = vector.broadcast %396 : vector<1x1x1xi32> to vector<1x8x128xi32>
    %398 = arith.cmpi sge, %6, %397 : vector<1x8x128xi32>
    %399 = arith.extui %398 : vector<1x8x128xi1> to vector<1x8x128xi32>
    %cst_104 = arith.constant dense<0> : vector<1x128xi32>
    %400 = vector.multi_reduction <add>, %399, %cst_104 [1] : vector<1x8x128xi32> to vector<1x128xi32>
    %401 = vector.shape_cast %400 : vector<1x128xi32> to vector<1x1x128xi32>
    %cst_105 = arith.constant dense<0> : vector<1x1xi32>
    %402 = vector.multi_reduction <add>, %401, %cst_105 [2] : vector<1x1x128xi32> to vector<1x1xi32>
    %403 = vector.shape_cast %402 : vector<1x1xi32> to vector<1x1x1xi32>
    %c204_i32_106 = arith.constant 204 : i32
    %404 = vector.broadcast %c204_i32_106 : i32 to vector<1x1x1xi32>
    %405 = arith.cmpi sge, %403, %404 : vector<1x1x1xi32>
    %c32_i32_107 = arith.constant 32 : i32
    %406 = vector.broadcast %c32_i32_107 : i32 to vector<1x1x1xi32>
    %407 = arith.addi %393, %406 : vector<1x1x1xi32>
    %408 = arith.select %405, %407, %393 : vector<1x1x1xi1>, vector<1x1x1xi32>
    %409 = arith.addi %18, %408 : vector<1x1x1xi32>
    %c16_i32 = arith.constant 16 : i32
    %410 = vector.broadcast %c16_i32 : i32 to vector<1x1x1xi32>
    %411 = arith.addi %409, %410 : vector<1x1x1xi32>
    %412 = vector.broadcast %411 : vector<1x1x1xi32> to vector<1x8x128xi32>
    %413 = arith.cmpi sge, %6, %412 : vector<1x8x128xi32>
    %414 = arith.extui %413 : vector<1x8x128xi1> to vector<1x8x128xi32>
    %cst_108 = arith.constant dense<0> : vector<1x128xi32>
    %415 = vector.multi_reduction <add>, %414, %cst_108 [1] : vector<1x8x128xi32> to vector<1x128xi32>
    %416 = vector.shape_cast %415 : vector<1x128xi32> to vector<1x1x128xi32>
    %cst_109 = arith.constant dense<0> : vector<1x1xi32>
    %417 = vector.multi_reduction <add>, %416, %cst_109 [2] : vector<1x1x128xi32> to vector<1x1xi32>
    %418 = vector.shape_cast %417 : vector<1x1xi32> to vector<1x1x1xi32>
    %c204_i32_110 = arith.constant 204 : i32
    %419 = vector.broadcast %c204_i32_110 : i32 to vector<1x1x1xi32>
    %420 = arith.cmpi sge, %418, %419 : vector<1x1x1xi32>
    %c16_i32_111 = arith.constant 16 : i32
    %421 = vector.broadcast %c16_i32_111 : i32 to vector<1x1x1xi32>
    %422 = arith.addi %408, %421 : vector<1x1x1xi32>
    %423 = arith.select %420, %422, %408 : vector<1x1x1xi1>, vector<1x1x1xi32>
    %424 = arith.addi %18, %423 : vector<1x1x1xi32>
    %c8_i32 = arith.constant 8 : i32
    %425 = vector.broadcast %c8_i32 : i32 to vector<1x1x1xi32>
    %426 = arith.addi %424, %425 : vector<1x1x1xi32>
    %427 = vector.broadcast %426 : vector<1x1x1xi32> to vector<1x8x128xi32>
    %428 = arith.cmpi sge, %6, %427 : vector<1x8x128xi32>
    %429 = arith.extui %428 : vector<1x8x128xi1> to vector<1x8x128xi32>
    %cst_112 = arith.constant dense<0> : vector<1x128xi32>
    %430 = vector.multi_reduction <add>, %429, %cst_112 [1] : vector<1x8x128xi32> to vector<1x128xi32>
    %431 = vector.shape_cast %430 : vector<1x128xi32> to vector<1x1x128xi32>
    %cst_113 = arith.constant dense<0> : vector<1x1xi32>
    %432 = vector.multi_reduction <add>, %431, %cst_113 [2] : vector<1x1x128xi32> to vector<1x1xi32>
    %433 = vector.shape_cast %432 : vector<1x1xi32> to vector<1x1x1xi32>
    %c204_i32_114 = arith.constant 204 : i32
    %434 = vector.broadcast %c204_i32_114 : i32 to vector<1x1x1xi32>
    %435 = arith.cmpi sge, %433, %434 : vector<1x1x1xi32>
    %c8_i32_115 = arith.constant 8 : i32
    %436 = vector.broadcast %c8_i32_115 : i32 to vector<1x1x1xi32>
    %437 = arith.addi %423, %436 : vector<1x1x1xi32>
    %438 = arith.select %435, %437, %423 : vector<1x1x1xi1>, vector<1x1x1xi32>
    %439 = arith.addi %18, %438 : vector<1x1x1xi32>
    %c4_i32 = arith.constant 4 : i32
    %440 = vector.broadcast %c4_i32 : i32 to vector<1x1x1xi32>
    %441 = arith.addi %439, %440 : vector<1x1x1xi32>
    %442 = vector.broadcast %441 : vector<1x1x1xi32> to vector<1x8x128xi32>
    %443 = arith.cmpi sge, %6, %442 : vector<1x8x128xi32>
    %444 = arith.extui %443 : vector<1x8x128xi1> to vector<1x8x128xi32>
    %cst_116 = arith.constant dense<0> : vector<1x128xi32>
    %445 = vector.multi_reduction <add>, %444, %cst_116 [1] : vector<1x8x128xi32> to vector<1x128xi32>
    %446 = vector.shape_cast %445 : vector<1x128xi32> to vector<1x1x128xi32>
    %cst_117 = arith.constant dense<0> : vector<1x1xi32>
    %447 = vector.multi_reduction <add>, %446, %cst_117 [2] : vector<1x1x128xi32> to vector<1x1xi32>
    %448 = vector.shape_cast %447 : vector<1x1xi32> to vector<1x1x1xi32>
    %c204_i32_118 = arith.constant 204 : i32
    %449 = vector.broadcast %c204_i32_118 : i32 to vector<1x1x1xi32>
    %450 = arith.cmpi sge, %448, %449 : vector<1x1x1xi32>
    %c4_i32_119 = arith.constant 4 : i32
    %451 = vector.broadcast %c4_i32_119 : i32 to vector<1x1x1xi32>
    %452 = arith.addi %438, %451 : vector<1x1x1xi32>
    %453 = arith.select %450, %452, %438 : vector<1x1x1xi1>, vector<1x1x1xi32>
    %454 = arith.addi %18, %453 : vector<1x1x1xi32>
    %c2_i32 = arith.constant 2 : i32
    %455 = vector.broadcast %c2_i32 : i32 to vector<1x1x1xi32>
    %456 = arith.addi %454, %455 : vector<1x1x1xi32>
    %457 = vector.broadcast %456 : vector<1x1x1xi32> to vector<1x8x128xi32>
    %458 = arith.cmpi sge, %6, %457 : vector<1x8x128xi32>
    %459 = arith.extui %458 : vector<1x8x128xi1> to vector<1x8x128xi32>
    %cst_120 = arith.constant dense<0> : vector<1x128xi32>
    %460 = vector.multi_reduction <add>, %459, %cst_120 [1] : vector<1x8x128xi32> to vector<1x128xi32>
    %461 = vector.shape_cast %460 : vector<1x128xi32> to vector<1x1x128xi32>
    %cst_121 = arith.constant dense<0> : vector<1x1xi32>
    %462 = vector.multi_reduction <add>, %461, %cst_121 [2] : vector<1x1x128xi32> to vector<1x1xi32>
    %463 = vector.shape_cast %462 : vector<1x1xi32> to vector<1x1x1xi32>
    %c204_i32_122 = arith.constant 204 : i32
    %464 = vector.broadcast %c204_i32_122 : i32 to vector<1x1x1xi32>
    %465 = arith.cmpi sge, %463, %464 : vector<1x1x1xi32>
    %c2_i32_123 = arith.constant 2 : i32
    %466 = vector.broadcast %c2_i32_123 : i32 to vector<1x1x1xi32>
    %467 = arith.addi %453, %466 : vector<1x1x1xi32>
    %468 = arith.select %465, %467, %453 : vector<1x1x1xi1>, vector<1x1x1xi32>
    %469 = arith.addi %18, %468 : vector<1x1x1xi32>
    %c1_i32 = arith.constant 1 : i32
    %470 = vector.broadcast %c1_i32 : i32 to vector<1x1x1xi32>
    %471 = arith.addi %469, %470 : vector<1x1x1xi32>
    %472 = vector.broadcast %471 : vector<1x1x1xi32> to vector<1x8x128xi32>
    %473 = arith.cmpi sge, %6, %472 : vector<1x8x128xi32>
    %474 = arith.extui %473 : vector<1x8x128xi1> to vector<1x8x128xi32>
    %cst_124 = arith.constant dense<0> : vector<1x128xi32>
    %475 = vector.multi_reduction <add>, %474, %cst_124 [1] : vector<1x8x128xi32> to vector<1x128xi32>
    %476 = vector.shape_cast %475 : vector<1x128xi32> to vector<1x1x128xi32>
    %cst_125 = arith.constant dense<0> : vector<1x1xi32>
    %477 = vector.multi_reduction <add>, %476, %cst_125 [2] : vector<1x1x128xi32> to vector<1x1xi32>
    %478 = vector.shape_cast %477 : vector<1x1xi32> to vector<1x1x1xi32>
    %c204_i32_126 = arith.constant 204 : i32
    %479 = vector.broadcast %c204_i32_126 : i32 to vector<1x1x1xi32>
    %480 = arith.cmpi sge, %478, %479 : vector<1x1x1xi32>
    %c1_i32_127 = arith.constant 1 : i32
    %481 = vector.broadcast %c1_i32_127 : i32 to vector<1x1x1xi32>
    %482 = arith.addi %468, %481 : vector<1x1x1xi32>
    %483 = arith.select %480, %482, %468 : vector<1x1x1xi1>, vector<1x1x1xi32>
    %484 = arith.addi %18, %483 : vector<1x1x1xi32>
    %485 = vector.broadcast %484 : vector<1x1x1xi32> to vector<1x8x128xi32>
    %486 = arith.cmpi sge, %6, %485 : vector<1x8x128xi32>
    %cst_128 = arith.constant 0.000000e+00 : f32
    %487 = vector.broadcast %cst_128 : f32 to vector<1x8x128xf32>
    %488 = arith.select %486, %0, %487 : vector<1x8x128xi1>, vector<1x8x128xf32>
    %c0_129 = arith.constant 0 : index
    %c0_130 = arith.constant 0 : index
    %c0_131 = arith.constant 0 : index
    %489 = vector.load %arg2[%c0_129, %c0_130, %c0_131] : memref<1x8x128xf32, #tpu.memory_space<vmem>>, vector<1x8x128xf32>
    tpu.vector_store %arg2[%c0_129, %c0_130, %c0_131], %488 {strides = array<i32>} : memref<1x8x128xf32, #tpu.memory_space<vmem>>, vector<1x8x128xf32>,
    return
  }
  func.func @transform_0(%arg0: i32) -> (i32, i32, i32) {
    %c0_i32 = arith.constant 0 : i32
    %c0_i32_0 = arith.constant 0 : i32
    %c0_i32_1 = arith.constant 0 : i32
    return %arg0, %c0_i32, %c0_i32_0 : i32, i32, i32
  }
  func.func @transform_1(%arg0: i32) -> (i32, i32, i32) {
    %c0_i32 = arith.constant 0 : i32
    %c0_i32_0 = arith.constant 0 : i32
    %c0_i32_1 = arith.constant 0 : i32
    return %arg0, %c0_i32, %c0_i32_0 : i32, i32, i32
  }
}

</mosaic_0001>

<bundles_post_ra>
// kernel: tpu_custom_call.1
= control target key start
LH: loop header
LB: loop body
LE: loop exit
PB: predicated region body
PF: predicated region fallthrough
CT: control target
= control target key end

     0   :  { %6 = vsyncpa [#allocation3], 0  ;;  %s1432_s0 = inlined_call_operand.hbm [shape: f32[2,8,128], index: 0, kind: input, shape index: {}]   ;;  %s1433_s1 = inlined_call_operand.hbm [shape: f32[2,8,128], index: 1, kind: output, shape index: {}]  }
   0x1   :  { %8 = vsyncpa [#allocation3 + $0x1], 0 }
   0x2   :  { %9 = vsyncpa [#allocation4], 0 }
   0x3   :  { %11 = vsyncpa [#allocation4 + $0x1], 0  ;;  %s1195_s6 = smov 0   ;;  %s1197_s7 = smov 0  }
   0x4   :  { %s1199_s8 = smov 0   ;;  %s1201_s9 = smov 0  }
   0x5 LB: > { %s1216_s10 = sadd.s32 4294967295, %s1181_s9   ;;  %s1024_s11 = sadd.s32 4294967294, %s1181_s9   ;;  %s1181_s9 = sphi %s1201_s9, %s1443_s9   ;;  %s1177_s8 = sphi %s1199_s8, %s1442_s8   ;;  %s1173_s7 = sphi %s1197_s7, %s1441_s7   ;;  %s1169_s6 = sphi %s1195_s6, %s1440_s6  }
   0x6   : > { %s1220_s12 = sadd.s32 1, %s1181_s9   ;;  %s24_s13 = sadd.s32 1, %s1177_s8 }
   0x7   : > { %s21_s14 = ssub.s32 %s1181_s9, %s1220_s12  ;;  %p31_p0 = scmp.ne.s32.totalorder %s1177_s8, %s1173_s7 }
   0x8   : > { %p22_p1 = scmp.eq.s32.totalorder %s21_s14, 0  ;;  %p32_p2 = scmp.eq.s32.totalorder %s1181_s9, 0 }
   0x9   : > { %p37_p3 = scmp.ne.s32.totalorder %s1173_s7, %s1169_s6  ;;  %p38_p4 = scmp.eq.s32.totalorder %s1216_s10, 0 }
   0xa   : > { %s1232_s15 = scalar_select %p22_p1, %s1177_s8, %s24_s13  }
   0xb   : > { %p1234_p5 = por %p32_p2, %p31_p0  ;;  %p1238_p6 = por %p38_p4, %p37_p3 }
   0xc   : > { %p61_p7 = scmp.eq.s32.totalorder %s1216_s10, 1  ;;  %p67_p8 = scmp.eq.s32.totalorder %s1024_s11, 1 }
   0xd   : > { %p1048_p10 = scmp.lt.s32.totalorder %s1181_s9, 2  ;;  %s87_s20 = sand.u32 1, %s1177_s8  }
   0xe   : > { %p1245_p11 = por %p61_p7, %p31_p0  ;;  %p1249_p12 = por %p67_p8, %p37_p3 }
   0xf   : > { %s1028_s21 = sshll.u32 %s1181_s9, 3  ;;  %s1027_s22 = sshll.u32 %s87_s20, 3 }
  0x10   : > { %s95_s25 = scalar_lea.hbm %s1432_s0, %s1028_s21  ;;  %s91_s27 = scalar_lea.vmem [#allocation2], %s1027_s22 }
  0x11   : > { %s97_s26 = sshll.u32 %s95_s25, 4  ;;  %s99_s28 = sshll.u32 %s91_s27, 4  ;;  %s98_s26 = int_to_ptr.hbm [resolvable:$true] %s97_s26  ;;  %s100_s28 = int_to_ptr.vmem [resolvable:$true] %s99_s28 }
  0x12   : > { %p1260_p13 = pnand %p1048_p10, %p1234_p5  ;;  %p1029_p0 = scmp.ge.s32.totalorder %s1181_s9, 1 }
  0x13   : > { %p104_p1 = scmp.lt.s32.totalorder %s1181_s9, 3  ;;  %s88_s30 = scalar_lea.sflag [#allocation3], %s87_s20 }
  0x14   : > { %s1085_s2 = sshra.s32 %s98_s26, 4  ;;  %p1089_p3 = pneg %p1260_p13  ;;  %s1086_s2 = int_to_ptr.hbm [resolvable:$true] %s1085_s2 }
  0x15   : > { %s1087_s3 = scalar_lea.hbm %s1086_s2, 8  ;;  %s1092_s11 = scalar_lea.hbm %s1432_s0, 16 }
  0x16   : > { %p1088_p2 = scmp.ne.s32.totalorder %s1086_s2, %s1087_s3  ;;  %p1093_p5 = scmp.lt.s32.totalorder %s1086_s2, %s1432_s0 }
  0x17   : > { %p1094_p8 = scmp.lt.s32.totalorder %s1092_s11, %s1087_s3 }
  0x18   : > { %p1090_p4 = pnand %p1089_p3, %p1088_p2 }
  0x19   : > { %p1095_p10 = por %p1094_p8, %p1093_p5 }
  0x1a   : > { %p1091_p7 = pneg %p1090_p4 }
  0x1c   : > { %p1096_p9 = pnand %p1095_p10, %p1091_p7 }
  0x1e   : > { %1099 = shalt.err (!%p1096_p9)
}
  0x1f   : > { %1043 = dma.hbm_to_vmem [thread:$0]  (!%p1260_p13), %s98_s26, 128, %s100_s28, %s88_s30  }
  0x20   : > { %p105_p2 = pnand %p1029_p0, %p104_p1 }
  0x21   : > { %s1281_s16 = sand.u32 (!%p105_p2), 1, %s1173_s7  }
  0x22   : > { %108 = sbr.rel (%p105_p2) target bundleno = 4735 (0x127f), region = 24  ;;  %s1030_s20 = sshll.u32 (!%p105_p2), %s1281_s16, 3 }
  0x23   : > { %s111_s21 = scalar_lea.sflag (!%p105_p2), [#allocation3], %s1281_s16  ;;  %s1287_s22 = scalar_lea.vmem (!%p105_p2), [#allocation2], %s1030_s20 }
  0x27   : > { %1160 = dma.done.wait (%p1238_p6), %s111_s21, 128  }
  0x28   : > { %1162 = vsyncadd (%p1238_p6), %s111_s21, 4294967168  ;;  %v134_v0 = vld [vmem:[%s1287_s22] sm:$0xff]  ;;  %v1183_v3 = vmov 0   ;;  %v1184_v21 = vmov 2147483648   ;;  %s1033_s17 = sshll.u32 %s1216_s10, 3  ;;  %s133_s26 = scalar_lea.vmem [#allocation5], %s1030_s20 }
  0x29   : > { %vm136_vm0 = vcmp.ge.s32.totalorder %v134_v0, 0  ;;  %v137_v1 = vxor.u32 2147483647, %v134_v0  ;;  %s949_s25 = scalar_lea.hbm %s1433_s1, %s1033_s17  ;;  %s951_s27 = sshll.u32 %s133_s26, 4  ;;  %s952_s27 = int_to_ptr.vmem [resolvable:$true] %s951_s27 }
  0x2a   : > { %s953_s28 = sshll.u32 %s949_s25, 4  ;;  %s939_s10 = scalar_lea.sflag [#allocation4], %s1281_s16  ;;  %s954_s28 = int_to_ptr.hbm [resolvable:$true] %s953_s28 }
  0x2b   : > { %v1294_v2 = vsel %vm136_vm0, %v134_v0, %v137_v1  ;;  %s1129_s29 = sshra.s32 %s954_s28, 4  ;;  %s1135_s4 = scalar_lea.hbm %s1433_s1, 16  ;;  %s1130_s29 = int_to_ptr.hbm [resolvable:$true] %s1129_s29 }
  0x2c   : > { %vm139_vm1 = vcmp.ge.s32.totalorder %v1294_v2, 0  ;;  %s1131_s30 = scalar_lea.hbm %s1130_s29, 8  ;;  %p1136_p0 = scmp.lt.s32.totalorder %s1130_s29, %s1433_s1 }
  0x2d   : > { %v140_v4 = vsel %vm139_vm1, 1, %v1183_v3  ;;  %p1132_p6 = scmp.ne.s32.totalorder %s1130_s29, %s1131_s30  ;;  %p1137_p1 = scmp.lt.s32.totalorder %s1135_s4, %s1131_s30 }
  0x2e   : > { %v141_v5 = vrot.slane %v140_v4, 4 }
  0x2f   : > { %p1133_p9 = pnand %p1132_p6, %p1245_p11  ;;  %p1138_p3 = por %p1137_p1, %p1136_p0 }
  0x30   : > { %v142_v6 = vadd.s32 %v141_v5, %v140_v4 }
  0x31   : > { %p1134_p13 = pneg %p1133_p9 }
  0x32   : > { %v143_v7 = vrot.slane %v142_v6, 2 }
  0x33   : > { %p1139_p4 = pnand %p1138_p3, %p1134_p13 }
  0x34   : > { %v144_v8 = vadd.s32 %v143_v7, %v142_v6 }
  0x36   : > { %v145_v9 = vrot.slane %v144_v8, 1 }
  0x38   : > { %v146_v10 = vadd.s32 %v145_v9, %v144_v8 }
  0x3a   : > { %v148_v11 = vshrl.u32 %v146_v10, 16  ;;  %v147_v13 = vand.u32 65535, %v146_v10 }
  0x3c   : > { %v150_v12 = vcvt.s32.f32 %v148_v11  ;;  %v149_v14 = vcvt.s32.f32 %v147_v13 }
  0x3e   : > { %153 = vadd.xlane.f32.xlu0 %v150_v12 }
  0x46   : > { %151 = vadd.xlane.f32.xlu0 %v149_v14 }
  0xb1   : > { %v154_v15 = vpop.xlane.xlu0 %153 }
  0xb2   : > { %v156_v16 = vcvt.f32.s32 %v154_v15 }
  0xb4   : > { %v157_v18 = vshll.u32 %v156_v16, 16 }
  0xb9   : > { %v152_v17 = vpop.xlane.xlu0 %151 }
  0xba   : > { %v155_v19 = vcvt.f32.s32 %v152_v17 }
  0xbc   : > { %v158_v20 = vadd.s32 %v157_v18, %v155_v19 }
  0xbe   : > { %vm159_vm2 = vcmp.ge.s32.totalorder %v158_v20, 204 }
  0xbf   : > { %v1298_v22 = vsel %vm159_vm2, 0, %v1184_v21 }
  0xc0   : > { %v161_v23 = vadd.s32 1073741824, %v1298_v22 }
  0xc2   : > { %vm162_vm3 = vcmp.ge.s32.totalorder %v1294_v2, %v161_v23 }
  0xc3   : > { %v163_v24 = vsel %vm162_vm3, 1, %v1183_v3 }
  0xc4   : > { %v164_v25 = vrot.slane %v163_v24, 4 }
  0xc6   : > { %v165_v26 = vadd.s32 %v164_v25, %v163_v24 }
  0xc8   : > { %v166_v27 = vrot.slane %v165_v26, 2 }
  0xca   : > { %v167_v28 = vadd.s32 %v166_v27, %v165_v26 }
  0xcc   : > { %v168_v29 = vrot.slane %v167_v28, 1 }
  0xce   : > { %v169_v30 = vadd.s32 %v168_v29, %v167_v28 }
  0xd0   : > { %v171_v31 = vshrl.u32 %v169_v30, 16  ;;  %v170_v33 = vand.u32 65535, %v169_v30 }
  0xd2   : > { %v173_v32 = vcvt.s32.f32 %v171_v31  ;;  %v172_v34 = vcvt.s32.f32 %v170_v33 }
  0xd4   : > { %176 = vadd.xlane.f32.xlu1 %v173_v32 }
  0xdc   : > { %174 = vadd.xlane.f32.xlu1 %v172_v34 }
 0x147   : > { %v177_v35 = vpop.xlane.xlu1 %176 }
 0x148   : > { %v179_v36 = vcvt.f32.s32 %v177_v35 }
 0x14a   : > { %v180_v38 = vshll.u32 %v179_v36, 16 }
 0x14f   : > { %v175_v37 = vpop.xlane.xlu1 %174 }
 0x150   : > { %v178_v39 = vcvt.f32.s32 %v175_v37 }
 0x152   : > { %v181_v40 = vadd.s32 %v180_v38, %v178_v39 }
 0x154   : > { %vm182_vm4 = vcmp.ge.s32.totalorder %v181_v40, 204 }
 0x155   : > { %v183_v41 = vsel %vm182_vm4, 1073741824, %v1183_v3 }
 0x156   : > { %v184_v42 = vadd.s32 %v183_v41, %v1298_v22  ;;  %v207_v61 = vadd.s32 536870912, %v183_v41 }
 0x158   : > { %v185_v43 = vadd.s32 536870912, %v184_v42 }
 0x15a   : > { %vm186_vm5 = vcmp.ge.s32.totalorder %v1294_v2, %v185_v43 }
 0x15b   : > { %v187_v44 = vsel %vm186_vm5, 1, %v1183_v3 }
 0x15c   : > { %v188_v45 = vrot.slane %v187_v44, 4 }
 0x15e   : > { %v189_v46 = vadd.s32 %v188_v45, %v187_v44 }
 0x160   : > { %v190_v47 = vrot.slane %v189_v46, 2 }
 0x162   : > { %v191_v48 = vadd.s32 %v190_v47, %v189_v46 }
 0x164   : > { %v192_v49 = vrot.slane %v191_v48, 1 }
 0x166   : > { %v193_v50 = vadd.s32 %v192_v49, %v191_v48 }
 0x168   : > { %v195_v51 = vshrl.u32 %v193_v50, 16  ;;  %v194_v53 = vand.u32 65535, %v193_v50 }
 0x16a   : > { %v197_v52 = vcvt.s32.f32 %v195_v51  ;;  %v196_v54 = vcvt.s32.f32 %v194_v53 }
 0x16c   : > { %200 = vadd.xlane.f32.xlu2 %v197_v52 }
 0x174   : > { %198 = vadd.xlane.f32.xlu2 %v196_v54 }
 0x1df   : > { %v201_v55 = vpop.xlane.xlu2 %200 }
 0x1e0   : > { %v203_v56 = vcvt.f32.s32 %v201_v55 }
 0x1e2   : > { %v204_v58 = vshll.u32 %v203_v56, 16 }
 0x1e7   : > { %v199_v57 = vpop.xlane.xlu2 %198 }
 0x1e8   : > { %v202_v59 = vcvt.f32.s32 %v199_v57 }
 0x1ea   : > { %v205_v60 = vadd.s32 %v204_v58, %v202_v59 }
 0x1ec   : > { %vm206_vm6 = vcmp.ge.s32.totalorder %v205_v60, 204 }
 0x1ed   : > { %v208_v62 = vsel %vm206_vm6, %v207_v61, %v183_v41 }
 0x1ee   : > { %v209_v63 = vadd.s32 %v208_v62, %v1298_v22  ;;  %v232_v20 = vadd.s32 268435456, %v208_v62 }
 0x1f0   : > { %v210_v0 = vadd.s32 268435456, %v209_v63 }
 0x1f2   : > { %vm211_vm7 = vcmp.ge.s32.totalorder %v1294_v2, %v210_v0 }
 0x1f3   : > { %v212_v1 = vsel %vm211_vm7, 1, %v1183_v3 }
 0x1f4   : > { %v213_v4 = vrot.slane %v212_v1, 4 }
 0x1f6   : > { %v214_v5 = vadd.s32 %v213_v4, %v212_v1 }
 0x1f8   : > { %v215_v6 = vrot.slane %v214_v5, 2 }
 0x1fa   : > { %v216_v7 = vadd.s32 %v215_v6, %v214_v5 }
 0x1fc   : > { %v217_v8 = vrot.slane %v216_v7, 1 }
 0x1fe   : > { %v218_v9 = vadd.s32 %v217_v8, %v216_v7 }
 0x200   : > { %v220_v10 = vshrl.u32 %v218_v9, 16  ;;  %v219_v11 = vand.u32 65535, %v218_v9 }
 0x202   : > { %v222_v12 = vcvt.s32.f32 %v220_v10  ;;  %v221_v13 = vcvt.s32.f32 %v219_v11 }
 0x204   : > { %225 = vadd.xlane.f32.xlu0 %v222_v12  ;;  %223 = vadd.xlane.f32.xlu1 %v221_v13 }
 0x277   : > { %v226_v14 = vpop.xlane.xlu0 %225  ;;  %v224_v15 = vpop.xlane.xlu1 %223 }
 0x278   : > { %v228_v16 = vcvt.f32.s32 %v226_v14  ;;  %v227_v18 = vcvt.f32.s32 %v224_v15 }
 0x27a   : > { %v229_v17 = vshll.u32 %v228_v16, 16 }
 0x27c   : > { %v230_v19 = vadd.s32 %v229_v17, %v227_v18 }
 0x27e   : > { %vm231_vm8 = vcmp.ge.s32.totalorder %v230_v19, 204 }
 0x27f   : > { %v233_v21 = vsel %vm231_vm8, %v232_v20, %v208_v62 }
 0x280   : > { %v234_v23 = vadd.s32 %v233_v21, %v1298_v22  ;;  %v257_v42 = vadd.s32 134217728, %v233_v21 }
 0x282   : > { %v235_v24 = vadd.s32 134217728, %v234_v23 }
 0x284   : > { %vm236_vm9 = vcmp.ge.s32.totalorder %v1294_v2, %v235_v24 }
 0x285   : > { %v237_v25 = vsel %vm236_vm9, 1, %v1183_v3 }
 0x286   : > { %v238_v26 = vrot.slane %v237_v25, 4 }
 0x288   : > { %v239_v27 = vadd.s32 %v238_v26, %v237_v25 }
 0x28a   : > { %v240_v28 = vrot.slane %v239_v27, 2 }
 0x28c   : > { %v241_v29 = vadd.s32 %v240_v28, %v239_v27 }
 0x28e   : > { %v242_v30 = vrot.slane %v241_v29, 1 }
 0x290   : > { %v243_v31 = vadd.s32 %v242_v30, %v241_v29 }
 0x292   : > { %v245_v32 = vshrl.u32 %v243_v31, 16  ;;  %v244_v33 = vand.u32 65535, %v243_v31 }
 0x294   : > { %v247_v34 = vcvt.s32.f32 %v245_v32  ;;  %v246_v35 = vcvt.s32.f32 %v244_v33 }
 0x296   : > { %250 = vadd.xlane.f32.xlu2 %v247_v34  ;;  %248 = vadd.xlane.f32.xlu0 %v246_v35 }
 0x309   : > { %v251_v36 = vpop.xlane.xlu2 %250  ;;  %v249_v37 = vpop.xlane.xlu0 %248 }
 0x30a   : > { %v253_v38 = vcvt.f32.s32 %v251_v36  ;;  %v252_v40 = vcvt.f32.s32 %v249_v37 }
 0x30c   : > { %v254_v39 = vshll.u32 %v253_v38, 16 }
 0x30e   : > { %v255_v41 = vadd.s32 %v254_v39, %v252_v40 }
 0x310   : > { %vm256_vm10 = vcmp.ge.s32.totalorder %v255_v41, 204 }
 0x311   : > { %v258_v43 = vsel %vm256_vm10, %v257_v42, %v233_v21 }
 0x312   : > { %v259_v44 = vadd.s32 %v258_v43, %v1298_v22  ;;  %v282_v63 = vadd.s32 67108864, %v258_v43 }
 0x314   : > { %v260_v45 = vadd.s32 67108864, %v259_v44 }
 0x316   : > { %vm261_vm11 = vcmp.ge.s32.totalorder %v1294_v2, %v260_v45 }
 0x317   : > { %v262_v46 = vsel %vm261_vm11, 1, %v1183_v3 }
 0x318   : > { %v263_v47 = vrot.slane %v262_v46, 4 }
 0x31a   : > { %v264_v48 = vadd.s32 %v263_v47, %v262_v46 }
 0x31c   : > { %v265_v49 = vrot.slane %v264_v48, 2 }
 0x31e   : > { %v266_v50 = vadd.s32 %v265_v49, %v264_v48 }
 0x320   : > { %v267_v51 = vrot.slane %v266_v50, 1 }
 0x322   : > { %v268_v52 = vadd.s32 %v267_v51, %v266_v50 }
 0x324   : > { %v270_v53 = vshrl.u32 %v268_v52, 16  ;;  %v269_v54 = vand.u32 65535, %v268_v52 }
 0x326   : > { %v272_v55 = vcvt.s32.f32 %v270_v53  ;;  %v271_v56 = vcvt.s32.f32 %v269_v54 }
 0x328   : > { %275 = vadd.xlane.f32.xlu1 %v272_v55  ;;  %273 = vadd.xlane.f32.xlu2 %v271_v56 }
 0x39b   : > { %v276_v57 = vpop.xlane.xlu1 %275  ;;  %v274_v58 = vpop.xlane.xlu2 %273 }
 0x39c   : > { %v278_v59 = vcvt.f32.s32 %v276_v57  ;;  %v277_v61 = vcvt.f32.s32 %v274_v58 }
 0x39e   : > { %v279_v60 = vshll.u32 %v278_v59, 16 }
 0x3a0   : > { %v280_v62 = vadd.s32 %v279_v60, %v277_v61 }
 0x3a2   : > { %vm281_vm12 = vcmp.ge.s32.totalorder %v280_v62, 204 }
 0x3a3   : > { %v283_v0 = vsel %vm281_vm12, %v282_v63, %v258_v43 }
 0x3a4   : > { %v284_v1 = vadd.s32 %v283_v0, %v1298_v22  ;;  %v307_v23 = vadd.s32 33554432, %v283_v0 }
 0x3a6   : > { %v285_v4 = vadd.s32 33554432, %v284_v1 }
 0x3a8   : > { %vm286_vm13 = vcmp.ge.s32.totalorder %v1294_v2, %v285_v4 }
 0x3a9   : > { %v287_v5 = vsel %vm286_vm13, 1, %v1183_v3 }
 0x3aa   : > { %v288_v6 = vrot.slane %v287_v5, 4 }
 0x3ac   : > { %v289_v7 = vadd.s32 %v288_v6, %v287_v5 }
 0x3ae   : > { %v290_v8 = vrot.slane %v289_v7, 2 }
 0x3b0   : > { %v291_v9 = vadd.s32 %v290_v8, %v289_v7 }
 0x3b2   : > { %v292_v10 = vrot.slane %v291_v9, 1 }
 0x3b4   : > { %v293_v11 = vadd.s32 %v292_v10, %v291_v9 }
 0x3b6   : > { %v295_v12 = vshrl.u32 %v293_v11, 16  ;;  %v294_v13 = vand.u32 65535, %v293_v11 }
 0x3b8   : > { %v297_v14 = vcvt.s32.f32 %v295_v12  ;;  %v296_v15 = vcvt.s32.f32 %v294_v13 }
 0x3ba   : > { %300 = vadd.xlane.f32.xlu0 %v297_v14  ;;  %298 = vadd.xlane.f32.xlu1 %v296_v15 }
 0x42d   : > { %v301_v16 = vpop.xlane.xlu0 %300  ;;  %v299_v17 = vpop.xlane.xlu1 %298 }
 0x42e   : > { %v303_v18 = vcvt.f32.s32 %v301_v16  ;;  %v302_v20 = vcvt.f32.s32 %v299_v17 }
 0x430   : > { %v304_v19 = vshll.u32 %v303_v18, 16 }
 0x432   : > { %v305_v21 = vadd.s32 %v304_v19, %v302_v20 }
 0x434   : > { %vm306_vm14 = vcmp.ge.s32.totalorder %v305_v21, 204 }
 0x435   : > { %v308_v24 = vsel %vm306_vm14, %v307_v23, %v283_v0 }
 0x436   : > { %v309_v25 = vadd.s32 %v308_v24, %v1298_v22  ;;  %v332_v44 = vadd.s32 16777216, %v308_v24 }
 0x438   : > { %v310_v26 = vadd.s32 16777216, %v309_v25 }
 0x43a   : > { %vm311_vm15 = vcmp.ge.s32.totalorder %v1294_v2, %v310_v26 }
 0x43b   : > { %v312_v27 = vsel %vm311_vm15, 1, %v1183_v3 }
 0x43c   : > { %v313_v28 = vrot.slane %v312_v27, 4 }
 0x43e   : > { %v314_v29 = vadd.s32 %v313_v28, %v312_v27 }
 0x440   : > { %v315_v30 = vrot.slane %v314_v29, 2 }
 0x442   : > { %v316_v31 = vadd.s32 %v315_v30, %v314_v29 }
 0x444   : > { %v317_v32 = vrot.slane %v316_v31, 1 }
 0x446   : > { %v318_v33 = vadd.s32 %v317_v32, %v316_v31 }
 0x448   : > { %v320_v34 = vshrl.u32 %v318_v33, 16  ;;  %v319_v35 = vand.u32 65535, %v318_v33 }
 0x44a   : > { %v322_v36 = vcvt.s32.f32 %v320_v34  ;;  %v321_v37 = vcvt.s32.f32 %v319_v35 }
 0x44c   : > { %325 = vadd.xlane.f32.xlu2 %v322_v36  ;;  %323 = vadd.xlane.f32.xlu0 %v321_v37 }
 0x4bf   : > { %v326_v38 = vpop.xlane.xlu2 %325  ;;  %v324_v39 = vpop.xlane.xlu0 %323 }
 0x4c0   : > { %v328_v40 = vcvt.f32.s32 %v326_v38  ;;  %v327_v42 = vcvt.f32.s32 %v324_v39 }
 0x4c2   : > { %v329_v41 = vshll.u32 %v328_v40, 16 }
 0x4c4   : > { %v330_v43 = vadd.s32 %v329_v41, %v327_v42 }
 0x4c6   : > { %vm331_vm0 = vcmp.ge.s32.totalorder %v330_v43, 204 }
 0x4c7   : > { %v333_v45 = vsel %vm331_vm0, %v332_v44, %v308_v24 }
 0x4c8   : > { %v334_v46 = vadd.s32 %v333_v45, %v1298_v22  ;;  %v357_v1 = vadd.s32 8388608, %v333_v45 }
 0x4ca   : > { %v335_v47 = vadd.s32 8388608, %v334_v46 }
 0x4cc   : > { %vm336_vm1 = vcmp.ge.s32.totalorder %v1294_v2, %v335_v47 }
 0x4cd   : > { %v337_v48 = vsel %vm336_vm1, 1, %v1183_v3 }
 0x4ce   : > { %v338_v49 = vrot.slane %v337_v48, 4 }
 0x4d0   : > { %v339_v50 = vadd.s32 %v338_v49, %v337_v48 }
 0x4d2   : > { %v340_v51 = vrot.slane %v339_v50, 2 }
 0x4d4   : > { %v341_v52 = vadd.s32 %v340_v51, %v339_v50 }
 0x4d6   : > { %v342_v53 = vrot.slane %v341_v52, 1 }
 0x4d8   : > { %v343_v54 = vadd.s32 %v342_v53, %v341_v52 }
 0x4da   : > { %v345_v55 = vshrl.u32 %v343_v54, 16  ;;  %v344_v56 = vand.u32 65535, %v343_v54 }
 0x4dc   : > { %v347_v57 = vcvt.s32.f32 %v345_v55  ;;  %v346_v58 = vcvt.s32.f32 %v344_v56 }
 0x4de   : > { %350 = vadd.xlane.f32.xlu1 %v347_v57  ;;  %348 = vadd.xlane.f32.xlu2 %v346_v58 }
 0x551   : > { %v351_v59 = vpop.xlane.xlu1 %350  ;;  %v349_v60 = vpop.xlane.xlu2 %348 }
 0x552   : > { %v353_v61 = vcvt.f32.s32 %v351_v59  ;;  %v352_v63 = vcvt.f32.s32 %v349_v60 }
 0x554   : > { %v354_v62 = vshll.u32 %v353_v61, 16 }
 0x556   : > { %v355_v0 = vadd.s32 %v354_v62, %v352_v63 }
 0x558   : > { %vm356_vm2 = vcmp.ge.s32.totalorder %v355_v0, 204 }
 0x559   : > { %v358_v4 = vsel %vm356_vm2, %v357_v1, %v333_v45 }
 0x55a   : > { %v359_v5 = vadd.s32 %v358_v4, %v1298_v22  ;;  %v382_v25 = vadd.s32 4194304, %v358_v4 }
 0x55c   : > { %v360_v6 = vadd.s32 4194304, %v359_v5 }
 0x55e   : > { %vm361_vm3 = vcmp.ge.s32.totalorder %v1294_v2, %v360_v6 }
 0x55f   : > { %v362_v7 = vsel %vm361_vm3, 1, %v1183_v3 }
 0x560   : > { %v363_v8 = vrot.slane %v362_v7, 4 }
 0x562   : > { %v364_v9 = vadd.s32 %v363_v8, %v362_v7 }
 0x564   : > { %v365_v10 = vrot.slane %v364_v9, 2 }
 0x566   : > { %v366_v11 = vadd.s32 %v365_v10, %v364_v9 }
 0x568   : > { %v367_v12 = vrot.slane %v366_v11, 1 }
 0x56a   : > { %v368_v13 = vadd.s32 %v367_v12, %v366_v11 }
 0x56c   : > { %v370_v14 = vshrl.u32 %v368_v13, 16  ;;  %v369_v15 = vand.u32 65535, %v368_v13 }
 0x56e   : > { %v372_v16 = vcvt.s32.f32 %v370_v14  ;;  %v371_v17 = vcvt.s32.f32 %v369_v15 }
 0x570   : > { %375 = vadd.xlane.f32.xlu0 %v372_v16  ;;  %373 = vadd.xlane.f32.xlu1 %v371_v17 }
 0x5e3   : > { %v376_v18 = vpop.xlane.xlu0 %375  ;;  %v374_v19 = vpop.xlane.xlu1 %373 }
 0x5e4   : > { %v378_v20 = vcvt.f32.s32 %v376_v18  ;;  %v377_v23 = vcvt.f32.s32 %v374_v19 }
 0x5e6   : > { %v379_v21 = vshll.u32 %v378_v20, 16 }
 0x5e8   : > { %v380_v24 = vadd.s32 %v379_v21, %v377_v23 }
 0x5ea   : > { %vm381_vm4 = vcmp.ge.s32.totalorder %v380_v24, 204 }
 0x5eb   : > { %v383_v26 = vsel %vm381_vm4, %v382_v25, %v358_v4 }
 0x5ec   : > { %v384_v27 = vadd.s32 %v383_v26, %v1298_v22  ;;  %v407_v46 = vadd.s32 2097152, %v383_v26 }
 0x5ee   : > { %v385_v28 = vadd.s32 2097152, %v384_v27 }
 0x5f0   : > { %vm386_vm5 = vcmp.ge.s32.totalorder %v1294_v2, %v385_v28 }
 0x5f1   : > { %v387_v29 = vsel %vm386_vm5, 1, %v1183_v3 }
 0x5f2   : > { %v388_v30 = vrot.slane %v387_v29, 4 }
 0x5f4   : > { %v389_v31 = vadd.s32 %v388_v30, %v387_v29 }
 0x5f6   : > { %v390_v32 = vrot.slane %v389_v31, 2 }
 0x5f8   : > { %v391_v33 = vadd.s32 %v390_v32, %v389_v31 }
 0x5fa   : > { %v392_v34 = vrot.slane %v391_v33, 1 }
 0x5fc   : > { %v393_v35 = vadd.s32 %v392_v34, %v391_v33 }
 0x5fe   : > { %v395_v36 = vshrl.u32 %v393_v35, 16  ;;  %v394_v37 = vand.u32 65535, %v393_v35 }
 0x600   : > { %v397_v38 = vcvt.s32.f32 %v395_v36  ;;  %v396_v39 = vcvt.s32.f32 %v394_v37 }
 0x602   : > { %400 = vadd.xlane.f32.xlu2 %v397_v38  ;;  %398 = vadd.xlane.f32.xlu0 %v396_v39 }
 0x675   : > { %v401_v40 = vpop.xlane.xlu2 %400  ;;  %v399_v41 = vpop.xlane.xlu0 %398 }
 0x676   : > { %v403_v42 = vcvt.f32.s32 %v401_v40  ;;  %v402_v44 = vcvt.f32.s32 %v399_v41 }
 0x678   : > { %v404_v43 = vshll.u32 %v403_v42, 16 }
 0x67a   : > { %v405_v45 = vadd.s32 %v404_v43, %v402_v44 }
 0x67c   : > { %vm406_vm6 = vcmp.ge.s32.totalorder %v405_v45, 204 }
 0x67d   : > { %v408_v47 = vsel %vm406_vm6, %v407_v46, %v383_v26 }
 0x67e   : > { %v409_v48 = vadd.s32 %v408_v47, %v1298_v22  ;;  %v432_v5 = vadd.s32 1048576, %v408_v47 }
 0x680   : > { %v410_v49 = vadd.s32 1048576, %v409_v48 }
 0x682   : > { %vm411_vm7 = vcmp.ge.s32.totalorder %v1294_v2, %v410_v49 }
 0x683   : > { %v412_v50 = vsel %vm411_vm7, 1, %v1183_v3 }
 0x684   : > { %v413_v51 = vrot.slane %v412_v50, 4 }
 0x686   : > { %v414_v52 = vadd.s32 %v413_v51, %v412_v50 }
 0x688   : > { %v415_v53 = vrot.slane %v414_v52, 2 }
 0x68a   : > { %v416_v54 = vadd.s32 %v415_v53, %v414_v52 }
 0x68c   : > { %v417_v55 = vrot.slane %v416_v54, 1 }
 0x68e   : > { %v418_v56 = vadd.s32 %v417_v55, %v416_v54 }
 0x690   : > { %v420_v57 = vshrl.u32 %v418_v56, 16  ;;  %v419_v58 = vand.u32 65535, %v418_v56 }
 0x692   : > { %v422_v59 = vcvt.s32.f32 %v420_v57  ;;  %v421_v60 = vcvt.s32.f32 %v419_v58 }
 0x694   : > { %425 = vadd.xlane.f32.xlu1 %v422_v59  ;;  %423 = vadd.xlane.f32.xlu2 %v421_v60 }
 0x707   : > { %v426_v61 = vpop.xlane.xlu1 %425  ;;  %v424_v62 = vpop.xlane.xlu2 %423 }
 0x708   : > { %v428_v63 = vcvt.f32.s32 %v426_v61  ;;  %v427_v1 = vcvt.f32.s32 %v424_v62 }
 0x70a   : > { %v429_v0 = vshll.u32 %v428_v63, 16 }
 0x70c   : > { %v430_v4 = vadd.s32 %v429_v0, %v427_v1 }
 0x70e   : > { %vm431_vm8 = vcmp.ge.s32.totalorder %v430_v4, 204 }
 0x70f   : > { %v433_v6 = vsel %vm431_vm8, %v432_v5, %v408_v47 }
 0x710   : > { %v434_v7 = vadd.s32 %v433_v6, %v1298_v22  ;;  %v457_v27 = vadd.s32 524288, %v433_v6 }
 0x712   : > { %v435_v8 = vadd.s32 524288, %v434_v7 }
 0x714   : > { %vm436_vm9 = vcmp.ge.s32.totalorder %v1294_v2, %v435_v8 }
 0x715   : > { %v437_v9 = vsel %vm436_vm9, 1, %v1183_v3 }
 0x716   : > { %v438_v10 = vrot.slane %v437_v9, 4 }
 0x718   : > { %v439_v11 = vadd.s32 %v438_v10, %v437_v9 }
 0x71a   : > { %v440_v12 = vrot.slane %v439_v11, 2 }
 0x71c   : > { %v441_v13 = vadd.s32 %v440_v12, %v439_v11 }
 0x71e   : > { %v442_v14 = vrot.slane %v441_v13, 1 }
 0x720   : > { %v443_v15 = vadd.s32 %v442_v14, %v441_v13 }
 0x722   : > { %v445_v16 = vshrl.u32 %v443_v15, 16  ;;  %v444_v17 = vand.u32 65535, %v443_v15 }
 0x724   : > { %v447_v18 = vcvt.s32.f32 %v445_v16  ;;  %v446_v19 = vcvt.s32.f32 %v444_v17 }
 0x726   : > { %450 = vadd.xlane.f32.xlu0 %v447_v18  ;;  %448 = vadd.xlane.f32.xlu1 %v446_v19 }
 0x799   : > { %v451_v20 = vpop.xlane.xlu0 %450  ;;  %v449_v21 = vpop.xlane.xlu1 %448 }
 0x79a   : > { %v453_v23 = vcvt.f32.s32 %v451_v20  ;;  %v452_v25 = vcvt.f32.s32 %v449_v21 }
 0x79c   : > { %v454_v24 = vshll.u32 %v453_v23, 16 }
 0x79e   : > { %v455_v26 = vadd.s32 %v454_v24, %v452_v25 }
 0x7a0   : > { %vm456_vm10 = vcmp.ge.s32.totalorder %v455_v26, 204 }
 0x7a1   : > { %v458_v28 = vsel %vm456_vm10, %v457_v27, %v433_v6 }
 0x7a2   : > { %v459_v29 = vadd.s32 %v458_v28, %v1298_v22  ;;  %v482_v48 = vadd.s32 262144, %v458_v28 }
 0x7a4   : > { %v460_v30 = vadd.s32 262144, %v459_v29 }
 0x7a6   : > { %vm461_vm11 = vcmp.ge.s32.totalorder %v1294_v2, %v460_v30 }
 0x7a7   : > { %v462_v31 = vsel %vm461_vm11, 1, %v1183_v3 }
 0x7a8   : > { %v463_v32 = vrot.slane %v462_v31, 4 }
 0x7aa   : > { %v464_v33 = vadd.s32 %v463_v32, %v462_v31 }
 0x7ac   : > { %v465_v34 = vrot.slane %v464_v33, 2 }
 0x7ae   : > { %v466_v35 = vadd.s32 %v465_v34, %v464_v33 }
 0x7b0   : > { %v467_v36 = vrot.slane %v466_v35, 1 }
 0x7b2   : > { %v468_v37 = vadd.s32 %v467_v36, %v466_v35 }
 0x7b4   : > { %v470_v38 = vshrl.u32 %v468_v37, 16  ;;  %v469_v39 = vand.u32 65535, %v468_v37 }
 0x7b6   : > { %v472_v40 = vcvt.s32.f32 %v470_v38  ;;  %v471_v41 = vcvt.s32.f32 %v469_v39 }
 0x7b8   : > { %475 = vadd.xlane.f32.xlu2 %v472_v40  ;;  %473 = vadd.xlane.f32.xlu0 %v471_v41 }
 0x82b   : > { %v476_v42 = vpop.xlane.xlu2 %475  ;;  %v474_v43 = vpop.xlane.xlu0 %473 }
 0x82c   : > { %v478_v44 = vcvt.f32.s32 %v476_v42  ;;  %v477_v46 = vcvt.f32.s32 %v474_v43 }
 0x82e   : > { %v479_v45 = vshll.u32 %v478_v44, 16 }
 0x830   : > { %v480_v47 = vadd.s32 %v479_v45, %v477_v46 }
 0x832   : > { %vm481_vm12 = vcmp.ge.s32.totalorder %v480_v47, 204 }
 0x833   : > { %v483_v49 = vsel %vm481_vm12, %v482_v48, %v458_v28 }
 0x834   : > { %v484_v50 = vadd.s32 %v483_v49, %v1298_v22  ;;  %v507_v7 = vadd.s32 131072, %v483_v49 }
 0x836   : > { %v485_v51 = vadd.s32 131072, %v484_v50 }
 0x838   : > { %vm486_vm13 = vcmp.ge.s32.totalorder %v1294_v2, %v485_v51 }
 0x839   : > { %v487_v52 = vsel %vm486_vm13, 1, %v1183_v3 }
 0x83a   : > { %v488_v53 = vrot.slane %v487_v52, 4 }
 0x83c   : > { %v489_v54 = vadd.s32 %v488_v53, %v487_v52 }
 0x83e   : > { %v490_v55 = vrot.slane %v489_v54, 2 }
 0x840   : > { %v491_v56 = vadd.s32 %v490_v55, %v489_v54 }
 0x842   : > { %v492_v57 = vrot.slane %v491_v56, 1 }
 0x844   : > { %v493_v58 = vadd.s32 %v492_v57, %v491_v56 }
 0x846   : > { %v495_v59 = vshrl.u32 %v493_v58, 16  ;;  %v494_v60 = vand.u32 65535, %v493_v58 }
 0x848   : > { %v497_v61 = vcvt.s32.f32 %v495_v59  ;;  %v496_v62 = vcvt.s32.f32 %v494_v60 }
 0x84a   : > { %500 = vadd.xlane.f32.xlu1 %v497_v61  ;;  %498 = vadd.xlane.f32.xlu2 %v496_v62 }
 0x8bd   : > { %v501_v63 = vpop.xlane.xlu1 %500  ;;  %v499_v0 = vpop.xlane.xlu2 %498 }
 0x8be   : > { %v503_v1 = vcvt.f32.s32 %v501_v63  ;;  %v502_v5 = vcvt.f32.s32 %v499_v0 }
 0x8c0   : > { %v504_v4 = vshll.u32 %v503_v1, 16 }
 0x8c2   : > { %v505_v6 = vadd.s32 %v504_v4, %v502_v5 }
 0x8c4   : > { %vm506_vm14 = vcmp.ge.s32.totalorder %v505_v6, 204 }
 0x8c5   : > { %v508_v8 = vsel %vm506_vm14, %v507_v7, %v483_v49 }
 0x8c6   : > { %v509_v9 = vadd.s32 %v508_v8, %v1298_v22  ;;  %v532_v29 = vadd.s32 65536, %v508_v8 }
 0x8c8   : > { %v510_v10 = vadd.s32 65536, %v509_v9 }
 0x8ca   : > { %vm511_vm15 = vcmp.ge.s32.totalorder %v1294_v2, %v510_v10 }
 0x8cb   : > { %v512_v11 = vsel %vm511_vm15, 1, %v1183_v3 }
 0x8cc   : > { %v513_v12 = vrot.slane %v512_v11, 4 }
 0x8ce   : > { %v514_v13 = vadd.s32 %v513_v12, %v512_v11 }
 0x8d0   : > { %v515_v14 = vrot.slane %v514_v13, 2 }
 0x8d2   : > { %v516_v15 = vadd.s32 %v515_v14, %v514_v13 }
 0x8d4   : > { %v517_v16 = vrot.slane %v516_v15, 1 }
 0x8d6   : > { %v518_v17 = vadd.s32 %v517_v16, %v516_v15 }
 0x8d8   : > { %v520_v18 = vshrl.u32 %v518_v17, 16  ;;  %v519_v19 = vand.u32 65535, %v518_v17 }
 0x8da   : > { %v522_v20 = vcvt.s32.f32 %v520_v18  ;;  %v521_v21 = vcvt.s32.f32 %v519_v19 }
 0x8dc   : > { %525 = vadd.xlane.f32.xlu0 %v522_v20  ;;  %523 = vadd.xlane.f32.xlu1 %v521_v21 }
 0x94f   : > { %v526_v23 = vpop.xlane.xlu0 %525  ;;  %v524_v24 = vpop.xlane.xlu1 %523 }
 0x950   : > { %v528_v25 = vcvt.f32.s32 %v526_v23  ;;  %v527_v27 = vcvt.f32.s32 %v524_v24 }
 0x952   : > { %v529_v26 = vshll.u32 %v528_v25, 16 }
 0x954   : > { %v530_v28 = vadd.s32 %v529_v26, %v527_v27 }
 0x956   : > { %vm531_vm0 = vcmp.ge.s32.totalorder %v530_v28, 204 }
 0x957   : > { %v533_v30 = vsel %vm531_vm0, %v532_v29, %v508_v8 }
 0x958   : > { %v534_v31 = vadd.s32 %v533_v30, %v1298_v22  ;;  %v557_v50 = vadd.s32 32768, %v533_v30 }
 0x95a   : > { %v535_v32 = vadd.s32 32768, %v534_v31 }
 0x95c   : > { %vm536_vm1 = vcmp.ge.s32.totalorder %v1294_v2, %v535_v32 }
 0x95d   : > { %v537_v33 = vsel %vm536_vm1, 1, %v1183_v3 }
 0x95e   : > { %v538_v34 = vrot.slane %v537_v33, 4 }
 0x960   : > { %v539_v35 = vadd.s32 %v538_v34, %v537_v33 }
 0x962   : > { %v540_v36 = vrot.slane %v539_v35, 2 }
 0x964   : > { %v541_v37 = vadd.s32 %v540_v36, %v539_v35 }
 0x966   : > { %v542_v38 = vrot.slane %v541_v37, 1 }
 0x968   : > { %v543_v39 = vadd.s32 %v542_v38, %v541_v37 }
 0x96a   : > { %v545_v40 = vshrl.u32 %v543_v39, 16  ;;  %v544_v41 = vand.u32 65535, %v543_v39 }
 0x96c   : > { %v547_v42 = vcvt.s32.f32 %v545_v40  ;;  %v546_v43 = vcvt.s32.f32 %v544_v41 }
 0x96e   : > { %550 = vadd.xlane.f32.xlu2 %v547_v42  ;;  %548 = vadd.xlane.f32.xlu0 %v546_v43 }
 0x9e1   : > { %v551_v44 = vpop.xlane.xlu2 %550  ;;  %v549_v45 = vpop.xlane.xlu0 %548 }
 0x9e2   : > { %v553_v46 = vcvt.f32.s32 %v551_v44  ;;  %v552_v48 = vcvt.f32.s32 %v549_v45 }
 0x9e4   : > { %v554_v47 = vshll.u32 %v553_v46, 16 }
 0x9e6   : > { %v555_v49 = vadd.s32 %v554_v47, %v552_v48 }
 0x9e8   : > { %vm556_vm2 = vcmp.ge.s32.totalorder %v555_v49, 204 }
 0x9e9   : > { %v558_v51 = vsel %vm556_vm2, %v557_v50, %v533_v30 }
 0x9ea   : > { %v559_v52 = vadd.s32 %v558_v51, %v1298_v22  ;;  %v582_v9 = vadd.s32 16384, %v558_v51 }
 0x9ec   : > { %v560_v53 = vadd.s32 16384, %v559_v52 }
 0x9ee   : > { %vm561_vm3 = vcmp.ge.s32.totalorder %v1294_v2, %v560_v53 }
 0x9ef   : > { %v562_v54 = vsel %vm561_vm3, 1, %v1183_v3 }
 0x9f0   : > { %v563_v55 = vrot.slane %v562_v54, 4 }
 0x9f2   : > { %v564_v56 = vadd.s32 %v563_v55, %v562_v54 }
 0x9f4   : > { %v565_v57 = vrot.slane %v564_v56, 2 }
 0x9f6   : > { %v566_v58 = vadd.s32 %v565_v57, %v564_v56 }
 0x9f8   : > { %v567_v59 = vrot.slane %v566_v58, 1 }
 0x9fa   : > { %v568_v60 = vadd.s32 %v567_v59, %v566_v58 }
 0x9fc   : > { %v570_v61 = vshrl.u32 %v568_v60, 16  ;;  %v569_v62 = vand.u32 65535, %v568_v60 }
 0x9fe   : > { %v572_v63 = vcvt.s32.f32 %v570_v61  ;;  %v571_v0 = vcvt.s32.f32 %v569_v62 }
 0xa00   : > { %575 = vadd.xlane.f32.xlu1 %v572_v63  ;;  %573 = vadd.xlane.f32.xlu2 %v571_v0 }
 0xa73   : > { %v576_v1 = vpop.xlane.xlu1 %575  ;;  %v574_v4 = vpop.xlane.xlu2 %573 }
 0xa74   : > { %v578_v5 = vcvt.f32.s32 %v576_v1  ;;  %v577_v7 = vcvt.f32.s32 %v574_v4 }
 0xa76   : > { %v579_v6 = vshll.u32 %v578_v5, 16 }
 0xa78   : > { %v580_v8 = vadd.s32 %v579_v6, %v577_v7 }
 0xa7a   : > { %vm581_vm4 = vcmp.ge.s32.totalorder %v580_v8, 204 }
 0xa7b   : > { %v583_v10 = vsel %vm581_vm4, %v582_v9, %v558_v51 }
 0xa7c   : > { %v584_v11 = vadd.s32 %v583_v10, %v1298_v22  ;;  %v607_v31 = vadd.s32 8192, %v583_v10 }
 0xa7e   : > { %v585_v12 = vadd.s32 8192, %v584_v11 }
 0xa80   : > { %vm586_vm5 = vcmp.ge.s32.totalorder %v1294_v2, %v585_v12 }
 0xa81   : > { %v587_v13 = vsel %vm586_vm5, 1, %v1183_v3 }
 0xa82   : > { %v588_v14 = vrot.slane %v587_v13, 4 }
 0xa84   : > { %v589_v15 = vadd.s32 %v588_v14, %v587_v13 }
 0xa86   : > { %v590_v16 = vrot.slane %v589_v15, 2 }
 0xa88   : > { %v591_v17 = vadd.s32 %v590_v16, %v589_v15 }
 0xa8a   : > { %v592_v18 = vrot.slane %v591_v17, 1 }
 0xa8c   : > { %v593_v19 = vadd.s32 %v592_v18, %v591_v17 }
 0xa8e   : > { %v595_v20 = vshrl.u32 %v593_v19, 16  ;;  %v594_v21 = vand.u32 65535, %v593_v19 }
 0xa90   : > { %v597_v23 = vcvt.s32.f32 %v595_v20  ;;  %v596_v24 = vcvt.s32.f32 %v594_v21 }
 0xa92   : > { %600 = vadd.xlane.f32.xlu0 %v597_v23  ;;  %598 = vadd.xlane.f32.xlu1 %v596_v24 }
 0xb05   : > { %v601_v25 = vpop.xlane.xlu0 %600  ;;  %v599_v26 = vpop.xlane.xlu1 %598 }
 0xb06   : > { %v603_v27 = vcvt.f32.s32 %v601_v25  ;;  %v602_v29 = vcvt.f32.s32 %v599_v26 }
 0xb08   : > { %v604_v28 = vshll.u32 %v603_v27, 16 }
 0xb0a   : > { %v605_v30 = vadd.s32 %v604_v28, %v602_v29 }
 0xb0c   : > { %vm606_vm6 = vcmp.ge.s32.totalorder %v605_v30, 204 }
 0xb0d   : > { %v608_v32 = vsel %vm606_vm6, %v607_v31, %v583_v10 }
 0xb0e   : > { %v609_v33 = vadd.s32 %v608_v32, %v1298_v22  ;;  %v632_v52 = vadd.s32 4096, %v608_v32 }
 0xb10   : > { %v610_v34 = vadd.s32 4096, %v609_v33 }
 0xb12   : > { %vm611_vm7 = vcmp.ge.s32.totalorder %v1294_v2, %v610_v34 }
 0xb13   : > { %v612_v35 = vsel %vm611_vm7, 1, %v1183_v3 }
 0xb14   : > { %v613_v36 = vrot.slane %v612_v35, 4 }
 0xb16   : > { %v614_v37 = vadd.s32 %v613_v36, %v612_v35 }
 0xb18   : > { %v615_v38 = vrot.slane %v614_v37, 2 }
 0xb1a   : > { %v616_v39 = vadd.s32 %v615_v38, %v614_v37 }
 0xb1c   : > { %v617_v40 = vrot.slane %v616_v39, 1 }
 0xb1e   : > { %v618_v41 = vadd.s32 %v617_v40, %v616_v39 }
 0xb20   : > { %v620_v42 = vshrl.u32 %v618_v41, 16  ;;  %v619_v43 = vand.u32 65535, %v618_v41 }
 0xb22   : > { %v622_v44 = vcvt.s32.f32 %v620_v42  ;;  %v621_v45 = vcvt.s32.f32 %v619_v43 }
 0xb24   : > { %625 = vadd.xlane.f32.xlu2 %v622_v44  ;;  %623 = vadd.xlane.f32.xlu0 %v621_v45 }
 0xb97   : > { %v626_v46 = vpop.xlane.xlu2 %625  ;;  %v624_v47 = vpop.xlane.xlu0 %623 }
 0xb98   : > { %v628_v48 = vcvt.f32.s32 %v626_v46  ;;  %v627_v50 = vcvt.f32.s32 %v624_v47 }
 0xb9a   : > { %v629_v49 = vshll.u32 %v628_v48, 16 }
 0xb9c   : > { %v630_v51 = vadd.s32 %v629_v49, %v627_v50 }
 0xb9e   : > { %vm631_vm8 = vcmp.ge.s32.totalorder %v630_v51, 204 }
 0xb9f   : > { %v633_v53 = vsel %vm631_vm8, %v632_v52, %v608_v32 }
 0xba0   : > { %v634_v54 = vadd.s32 %v633_v53, %v1298_v22  ;;  %v657_v11 = vadd.s32 2048, %v633_v53 }
 0xba2   : > { %v635_v55 = vadd.s32 2048, %v634_v54 }
 0xba4   : > { %vm636_vm9 = vcmp.ge.s32.totalorder %v1294_v2, %v635_v55 }
 0xba5   : > { %v637_v56 = vsel %vm636_vm9, 1, %v1183_v3 }
 0xba6   : > { %v638_v57 = vrot.slane %v637_v56, 4 }
 0xba8   : > { %v639_v58 = vadd.s32 %v638_v57, %v637_v56 }
 0xbaa   : > { %v640_v59 = vrot.slane %v639_v58, 2 }
 0xbac   : > { %v641_v60 = vadd.s32 %v640_v59, %v639_v58 }
 0xbae   : > { %v642_v61 = vrot.slane %v641_v60, 1 }
 0xbb0   : > { %v643_v62 = vadd.s32 %v642_v61, %v641_v60 }
 0xbb2   : > { %v645_v63 = vshrl.u32 %v643_v62, 16  ;;  %v644_v0 = vand.u32 65535, %v643_v62 }
 0xbb4   : > { %v647_v1 = vcvt.s32.f32 %v645_v63  ;;  %v646_v4 = vcvt.s32.f32 %v644_v0 }
 0xbb6   : > { %650 = vadd.xlane.f32.xlu1 %v647_v1  ;;  %648 = vadd.xlane.f32.xlu2 %v646_v4 }
 0xc29   : > { %v651_v5 = vpop.xlane.xlu1 %650  ;;  %v649_v6 = vpop.xlane.xlu2 %648 }
 0xc2a   : > { %v653_v7 = vcvt.f32.s32 %v651_v5  ;;  %v652_v9 = vcvt.f32.s32 %v649_v6 }
 0xc2c   : > { %v654_v8 = vshll.u32 %v653_v7, 16 }
 0xc2e   : > { %v655_v10 = vadd.s32 %v654_v8, %v652_v9 }
 0xc30   : > { %vm656_vm10 = vcmp.ge.s32.totalorder %v655_v10, 204 }
 0xc31   : > { %v658_v12 = vsel %vm656_vm10, %v657_v11, %v633_v53 }
 0xc32   : > { %v659_v13 = vadd.s32 %v658_v12, %v1298_v22  ;;  %v682_v33 = vadd.s32 1024, %v658_v12 }
 0xc34   : > { %v660_v14 = vadd.s32 1024, %v659_v13 }
 0xc36   : > { %vm661_vm11 = vcmp.ge.s32.totalorder %v1294_v2, %v660_v14 }
 0xc37   : > { %v662_v15 = vsel %vm661_vm11, 1, %v1183_v3 }
 0xc38   : > { %v663_v16 = vrot.slane %v662_v15, 4 }
 0xc3a   : > { %v664_v17 = vadd.s32 %v663_v16, %v662_v15 }
 0xc3c   : > { %v665_v18 = vrot.slane %v664_v17, 2 }
 0xc3e   : > { %v666_v19 = vadd.s32 %v665_v18, %v664_v17 }
 0xc40   : > { %v667_v20 = vrot.slane %v666_v19, 1 }
 0xc42   : > { %v668_v21 = vadd.s32 %v667_v20, %v666_v19 }
 0xc44   : > { %v670_v23 = vshrl.u32 %v668_v21, 16  ;;  %v669_v24 = vand.u32 65535, %v668_v21 }
 0xc46   : > { %v672_v25 = vcvt.s32.f32 %v670_v23  ;;  %v671_v26 = vcvt.s32.f32 %v669_v24 }
 0xc48   : > { %675 = vadd.xlane.f32.xlu0 %v672_v25  ;;  %673 = vadd.xlane.f32.xlu1 %v671_v26 }
 0xcbb   : > { %v676_v27 = vpop.xlane.xlu0 %675  ;;  %v674_v28 = vpop.xlane.xlu1 %673 }
 0xcbc   : > { %v678_v29 = vcvt.f32.s32 %v676_v27  ;;  %v677_v31 = vcvt.f32.s32 %v674_v28 }
 0xcbe   : > { %v679_v30 = vshll.u32 %v678_v29, 16 }
 0xcc0   : > { %v680_v32 = vadd.s32 %v679_v30, %v677_v31 }
 0xcc2   : > { %vm681_vm12 = vcmp.ge.s32.totalorder %v680_v32, 204 }
 0xcc3   : > { %v683_v34 = vsel %vm681_vm12, %v682_v33, %v658_v12 }
 0xcc4   : > { %v684_v35 = vadd.s32 %v683_v34, %v1298_v22  ;;  %v707_v54 = vadd.s32 512, %v683_v34 }
 0xcc6   : > { %v685_v36 = vadd.s32 512, %v684_v35 }
 0xcc8   : > { %vm686_vm13 = vcmp.ge.s32.totalorder %v1294_v2, %v685_v36 }
 0xcc9   : > { %v687_v37 = vsel %vm686_vm13, 1, %v1183_v3 }
 0xcca   : > { %v688_v38 = vrot.slane %v687_v37, 4 }
 0xccc   : > { %v689_v39 = vadd.s32 %v688_v38, %v687_v37 }
 0xcce   : > { %v690_v40 = vrot.slane %v689_v39, 2 }
 0xcd0   : > { %v691_v41 = vadd.s32 %v690_v40, %v689_v39 }
 0xcd2   : > { %v692_v42 = vrot.slane %v691_v41, 1 }
 0xcd4   : > { %v693_v43 = vadd.s32 %v692_v42, %v691_v41 }
 0xcd6   : > { %v695_v44 = vshrl.u32 %v693_v43, 16  ;;  %v694_v45 = vand.u32 65535, %v693_v43 }
 0xcd8   : > { %v697_v46 = vcvt.s32.f32 %v695_v44  ;;  %v696_v47 = vcvt.s32.f32 %v694_v45 }
 0xcda   : > { %700 = vadd.xlane.f32.xlu2 %v697_v46  ;;  %698 = vadd.xlane.f32.xlu0 %v696_v47 }
 0xd4d   : > { %v701_v48 = vpop.xlane.xlu2 %700  ;;  %v699_v49 = vpop.xlane.xlu0 %698 }
 0xd4e   : > { %v703_v50 = vcvt.f32.s32 %v701_v48  ;;  %v702_v52 = vcvt.f32.s32 %v699_v49 }
 0xd50   : > { %v704_v51 = vshll.u32 %v703_v50, 16 }
 0xd52   : > { %v705_v53 = vadd.s32 %v704_v51, %v702_v52 }
 0xd54   : > { %vm706_vm14 = vcmp.ge.s32.totalorder %v705_v53, 204 }
 0xd55   : > { %v708_v55 = vsel %vm706_vm14, %v707_v54, %v683_v34 }
 0xd56   : > { %v709_v56 = vadd.s32 %v708_v55, %v1298_v22  ;;  %v732_v13 = vadd.s32 256, %v708_v55 }
 0xd58   : > { %v710_v57 = vadd.s32 256, %v709_v56 }
 0xd5a   : > { %vm711_vm15 = vcmp.ge.s32.totalorder %v1294_v2, %v710_v57 }
 0xd5b   : > { %v712_v58 = vsel %vm711_vm15, 1, %v1183_v3 }
 0xd5c   : > { %v713_v59 = vrot.slane %v712_v58, 4 }
 0xd5e   : > { %v714_v60 = vadd.s32 %v713_v59, %v712_v58 }
 0xd60   : > { %v715_v61 = vrot.slane %v714_v60, 2 }
 0xd62   : > { %v716_v62 = vadd.s32 %v715_v61, %v714_v60 }
 0xd64   : > { %v717_v63 = vrot.slane %v716_v62, 1 }
 0xd66   : > { %v718_v0 = vadd.s32 %v717_v63, %v716_v62 }
 0xd68   : > { %v720_v1 = vshrl.u32 %v718_v0, 16  ;;  %v719_v4 = vand.u32 65535, %v718_v0 }
 0xd6a   : > { %v722_v5 = vcvt.s32.f32 %v720_v1  ;;  %v721_v6 = vcvt.s32.f32 %v719_v4 }
 0xd6c   : > { %725 = vadd.xlane.f32.xlu1 %v722_v5  ;;  %723 = vadd.xlane.f32.xlu2 %v721_v6 }
 0xddf   : > { %v726_v7 = vpop.xlane.xlu1 %725  ;;  %v724_v8 = vpop.xlane.xlu2 %723 }
 0xde0   : > { %v728_v9 = vcvt.f32.s32 %v726_v7  ;;  %v727_v11 = vcvt.f32.s32 %v724_v8 }
 0xde2   : > { %v729_v10 = vshll.u32 %v728_v9, 16 }
 0xde4   : > { %v730_v12 = vadd.s32 %v729_v10, %v727_v11 }
 0xde6   : > { %vm731_vm0 = vcmp.ge.s32.totalorder %v730_v12, 204 }
 0xde7   : > { %v733_v14 = vsel %vm731_vm0, %v732_v13, %v708_v55 }
 0xde8   : > { %v734_v15 = vadd.s32 %v733_v14, %v1298_v22  ;;  %v757_v35 = vadd.s32 128, %v733_v14 }
 0xdea   : > { %v735_v16 = vadd.s32 128, %v734_v15 }
 0xdec   : > { %vm736_vm1 = vcmp.ge.s32.totalorder %v1294_v2, %v735_v16 }
 0xded   : > { %v737_v17 = vsel %vm736_vm1, 1, %v1183_v3 }
 0xdee   : > { %v738_v18 = vrot.slane %v737_v17, 4 }
 0xdf0   : > { %v739_v19 = vadd.s32 %v738_v18, %v737_v17 }
 0xdf2   : > { %v740_v20 = vrot.slane %v739_v19, 2 }
 0xdf4   : > { %v741_v21 = vadd.s32 %v740_v20, %v739_v19 }
 0xdf6   : > { %v742_v23 = vrot.slane %v741_v21, 1 }
 0xdf8   : > { %v743_v24 = vadd.s32 %v742_v23, %v741_v21 }
 0xdfa   : > { %v745_v25 = vshrl.u32 %v743_v24, 16  ;;  %v744_v26 = vand.u32 65535, %v743_v24 }
 0xdfc   : > { %v747_v27 = vcvt.s32.f32 %v745_v25  ;;  %v746_v28 = vcvt.s32.f32 %v744_v26 }
 0xdfe   : > { %750 = vadd.xlane.f32.xlu0 %v747_v27  ;;  %748 = vadd.xlane.f32.xlu1 %v746_v28 }
 0xe71   : > { %v751_v29 = vpop.xlane.xlu0 %750  ;;  %v749_v30 = vpop.xlane.xlu1 %748 }
 0xe72   : > { %v753_v31 = vcvt.f32.s32 %v751_v29  ;;  %v752_v33 = vcvt.f32.s32 %v749_v30 }
 0xe74   : > { %v754_v32 = vshll.u32 %v753_v31, 16 }
 0xe76   : > { %v755_v34 = vadd.s32 %v754_v32, %v752_v33 }
 0xe78   : > { %vm756_vm2 = vcmp.ge.s32.totalorder %v755_v34, 204 }
 0xe79   : > { %v758_v36 = vsel %vm756_vm2, %v757_v35, %v733_v14 }
 0xe7a   : > { %v759_v37 = vadd.s32 %v758_v36, %v1298_v22  ;;  %v782_v56 = vadd.s32 64, %v758_v36 }
 0xe7c   : > { %v760_v38 = vadd.s32 64, %v759_v37 }
 0xe7e   : > { %vm761_vm3 = vcmp.ge.s32.totalorder %v1294_v2, %v760_v38 }
 0xe7f   : > { %v762_v39 = vsel %vm761_vm3, 1, %v1183_v3 }
 0xe80   : > { %v763_v40 = vrot.slane %v762_v39, 4 }
 0xe82   : > { %v764_v41 = vadd.s32 %v763_v40, %v762_v39 }
 0xe84   : > { %v765_v42 = vrot.slane %v764_v41, 2 }
 0xe86   : > { %v766_v43 = vadd.s32 %v765_v42, %v764_v41 }
 0xe88   : > { %v767_v44 = vrot.slane %v766_v43, 1 }
 0xe8a   : > { %v768_v45 = vadd.s32 %v767_v44, %v766_v43 }
 0xe8c   : > { %v770_v46 = vshrl.u32 %v768_v45, 16  ;;  %v769_v47 = vand.u32 65535, %v768_v45 }
 0xe8e   : > { %v772_v48 = vcvt.s32.f32 %v770_v46  ;;  %v771_v49 = vcvt.s32.f32 %v769_v47 }
 0xe90   : > { %775 = vadd.xlane.f32.xlu2 %v772_v48  ;;  %773 = vadd.xlane.f32.xlu0 %v771_v49 }
 0xf03   : > { %v776_v50 = vpop.xlane.xlu2 %775  ;;  %v774_v51 = vpop.xlane.xlu0 %773 }
 0xf04   : > { %v778_v52 = vcvt.f32.s32 %v776_v50  ;;  %v777_v54 = vcvt.f32.s32 %v774_v51 }
 0xf06   : > { %v779_v53 = vshll.u32 %v778_v52, 16 }
 0xf08   : > { %v780_v55 = vadd.s32 %v779_v53, %v777_v54 }
 0xf0a   : > { %vm781_vm4 = vcmp.ge.s32.totalorder %v780_v55, 204 }
 0xf0b   : > { %v783_v57 = vsel %vm781_vm4, %v782_v56, %v758_v36 }
 0xf0c   : > { %v784_v58 = vadd.s32 %v783_v57, %v1298_v22  ;;  %v807_v15 = vadd.s32 32, %v783_v57 }
 0xf0e   : > { %v785_v59 = vadd.s32 32, %v784_v58 }
 0xf10   : > { %vm786_vm5 = vcmp.ge.s32.totalorder %v1294_v2, %v785_v59 }
 0xf11   : > { %v787_v60 = vsel %vm786_vm5, 1, %v1183_v3 }
 0xf12   : > { %v788_v61 = vrot.slane %v787_v60, 4 }
 0xf14   : > { %v789_v62 = vadd.s32 %v788_v61, %v787_v60 }
 0xf16   : > { %v790_v63 = vrot.slane %v789_v62, 2 }
 0xf18   : > { %v791_v0 = vadd.s32 %v790_v63, %v789_v62 }
 0xf1a   : > { %v792_v1 = vrot.slane %v791_v0, 1 }
 0xf1c   : > { %v793_v4 = vadd.s32 %v792_v1, %v791_v0 }
 0xf1e   : > { %v795_v5 = vshrl.u32 %v793_v4, 16  ;;  %v794_v6 = vand.u32 65535, %v793_v4 }
 0xf20   : > { %v797_v7 = vcvt.s32.f32 %v795_v5  ;;  %v796_v8 = vcvt.s32.f32 %v794_v6 }
 0xf22   : > { %800 = vadd.xlane.f32.xlu1 %v797_v7  ;;  %798 = vadd.xlane.f32.xlu2 %v796_v8 }
 0xf95   : > { %v801_v9 = vpop.xlane.xlu1 %800  ;;  %v799_v10 = vpop.xlane.xlu2 %798 }
 0xf96   : > { %v803_v11 = vcvt.f32.s32 %v801_v9  ;;  %v802_v13 = vcvt.f32.s32 %v799_v10 }
 0xf98   : > { %v804_v12 = vshll.u32 %v803_v11, 16 }
 0xf9a   : > { %v805_v14 = vadd.s32 %v804_v12, %v802_v13 }
 0xf9c   : > { %vm806_vm6 = vcmp.ge.s32.totalorder %v805_v14, 204 }
 0xf9d   : > { %v808_v16 = vsel %vm806_vm6, %v807_v15, %v783_v57 }
 0xf9e   : > { %v809_v17 = vadd.s32 %v808_v16, %v1298_v22  ;;  %v832_v37 = vadd.s32 16, %v808_v16 }
 0xfa0   : > { %v810_v18 = vadd.s32 16, %v809_v17 }
 0xfa2   : > { %vm811_vm7 = vcmp.ge.s32.totalorder %v1294_v2, %v810_v18 }
 0xfa3   : > { %v812_v19 = vsel %vm811_vm7, 1, %v1183_v3 }
 0xfa4   : > { %v813_v20 = vrot.slane %v812_v19, 4 }
 0xfa6   : > { %v814_v21 = vadd.s32 %v813_v20, %v812_v19 }
 0xfa8   : > { %v815_v23 = vrot.slane %v814_v21, 2 }
 0xfaa   : > { %v816_v24 = vadd.s32 %v815_v23, %v814_v21 }
 0xfac   : > { %v817_v25 = vrot.slane %v816_v24, 1 }
 0xfae   : > { %v818_v26 = vadd.s32 %v817_v25, %v816_v24 }
 0xfb0   : > { %v820_v27 = vshrl.u32 %v818_v26, 16  ;;  %v819_v28 = vand.u32 65535, %v818_v26 }
 0xfb2   : > { %v822_v29 = vcvt.s32.f32 %v820_v27  ;;  %v821_v30 = vcvt.s32.f32 %v819_v28 }
 0xfb4   : > { %825 = vadd.xlane.f32.xlu0 %v822_v29  ;;  %823 = vadd.xlane.f32.xlu1 %v821_v30 }
0x1027   : > { %v826_v31 = vpop.xlane.xlu0 %825  ;;  %v824_v32 = vpop.xlane.xlu1 %823 }
0x1028   : > { %v828_v33 = vcvt.f32.s32 %v826_v31  ;;  %v827_v35 = vcvt.f32.s32 %v824_v32 }
0x102a   : > { %v829_v34 = vshll.u32 %v828_v33, 16 }
0x102c   : > { %v830_v36 = vadd.s32 %v829_v34, %v827_v35 }
0x102e   : > { %vm831_vm8 = vcmp.ge.s32.totalorder %v830_v36, 204 }
0x102f   : > { %v833_v38 = vsel %vm831_vm8, %v832_v37, %v808_v16 }
0x1030   : > { %v834_v39 = vadd.s32 %v833_v38, %v1298_v22  ;;  %v857_v58 = vadd.s32 8, %v833_v38 }
0x1032   : > { %v835_v40 = vadd.s32 8, %v834_v39 }
0x1034   : > { %vm836_vm9 = vcmp.ge.s32.totalorder %v1294_v2, %v835_v40 }
0x1035   : > { %v837_v41 = vsel %vm836_vm9, 1, %v1183_v3 }
0x1036   : > { %v838_v42 = vrot.slane %v837_v41, 4 }
0x1038   : > { %v839_v43 = vadd.s32 %v838_v42, %v837_v41 }
0x103a   : > { %v840_v44 = vrot.slane %v839_v43, 2 }
0x103c   : > { %v841_v45 = vadd.s32 %v840_v44, %v839_v43 }
0x103e   : > { %v842_v46 = vrot.slane %v841_v45, 1 }
0x1040   : > { %v843_v47 = vadd.s32 %v842_v46, %v841_v45 }
0x1042   : > { %v845_v48 = vshrl.u32 %v843_v47, 16  ;;  %v844_v49 = vand.u32 65535, %v843_v47 }
0x1044   : > { %v847_v50 = vcvt.s32.f32 %v845_v48  ;;  %v846_v51 = vcvt.s32.f32 %v844_v49 }
0x1046   : > { %850 = vadd.xlane.f32.xlu2 %v847_v50  ;;  %848 = vadd.xlane.f32.xlu0 %v846_v51 }
0x10b9   : > { %v851_v52 = vpop.xlane.xlu2 %850  ;;  %v849_v53 = vpop.xlane.xlu0 %848 }
0x10ba   : > { %v853_v54 = vcvt.f32.s32 %v851_v52  ;;  %v852_v56 = vcvt.f32.s32 %v849_v53 }
0x10bc   : > { %v854_v55 = vshll.u32 %v853_v54, 16 }
0x10be   : > { %v855_v57 = vadd.s32 %v854_v55, %v852_v56 }
0x10c0   : > { %vm856_vm10 = vcmp.ge.s32.totalorder %v855_v57, 204 }
0x10c1   : > { %v858_v59 = vsel %vm856_vm10, %v857_v58, %v833_v38 }
0x10c2   : > { %v859_v60 = vadd.s32 %v858_v59, %v1298_v22  ;;  %v882_v17 = vadd.s32 4, %v858_v59 }
0x10c4   : > { %v860_v61 = vadd.s32 4, %v859_v60 }
0x10c6   : > { %vm861_vm11 = vcmp.ge.s32.totalorder %v1294_v2, %v860_v61 }
0x10c7   : > { %v862_v62 = vsel %vm861_vm11, 1, %v1183_v3 }
0x10c8   : > { %v863_v63 = vrot.slane %v862_v62, 4 }
0x10ca   : > { %v864_v0 = vadd.s32 %v863_v63, %v862_v62  ;;  %v1084_v62 = vld [vmem:[%s1287_s22] sm:$0xff] }
0x10cc   : > { %v865_v1 = vrot.slane %v864_v0, 2 }
0x10ce   : > { %v866_v4 = vadd.s32 %v865_v1, %v864_v0 }
0x10d0   : > { %v867_v5 = vrot.slane %v866_v4, 1 }
0x10d2   : > { %v868_v6 = vadd.s32 %v867_v5, %v866_v4 }
0x10d4   : > { %v870_v7 = vshrl.u32 %v868_v6, 16  ;;  %v869_v8 = vand.u32 65535, %v868_v6 }
0x10d6   : > { %v872_v9 = vcvt.s32.f32 %v870_v7  ;;  %v871_v10 = vcvt.s32.f32 %v869_v8 }
0x10d8   : > { %875 = vadd.xlane.f32.xlu1 %v872_v9  ;;  %873 = vadd.xlane.f32.xlu2 %v871_v10 }
0x114b   : > { %v876_v11 = vpop.xlane.xlu1 %875  ;;  %v874_v12 = vpop.xlane.xlu2 %873 }
0x114c   : > { %v878_v13 = vcvt.f32.s32 %v876_v11  ;;  %v877_v15 = vcvt.f32.s32 %v874_v12 }
0x114e   : > { %v879_v14 = vshll.u32 %v878_v13, 16 }
0x1150   : > { %v880_v16 = vadd.s32 %v879_v14, %v877_v15 }
0x1152   : > { %vm881_vm12 = vcmp.ge.s32.totalorder %v880_v16, 204 }
0x1153   : > { %v883_v18 = vsel %vm881_vm12, %v882_v17, %v858_v59 }
0x1154   : > { %v884_v19 = vadd.s32 %v883_v18, %v1298_v22  ;;  %v907_v39 = vadd.s32 2, %v883_v18 }
0x1156   : > { %v885_v20 = vadd.s32 2, %v884_v19 }
0x1158   : > { %vm886_vm13 = vcmp.ge.s32.totalorder %v1294_v2, %v885_v20 }
0x1159   : > { %v887_v21 = vsel %vm886_vm13, 1, %v1183_v3 }
0x115a   : > { %v888_v23 = vrot.slane %v887_v21, 4 }
0x115c   : > { %v889_v24 = vadd.s32 %v888_v23, %v887_v21 }
0x115e   : > { %v890_v25 = vrot.slane %v889_v24, 2 }
0x1160   : > { %v891_v26 = vadd.s32 %v890_v25, %v889_v24 }
0x1162   : > { %v892_v27 = vrot.slane %v891_v26, 1 }
0x1164   : > { %v893_v28 = vadd.s32 %v892_v27, %v891_v26 }
0x1166   : > { %v895_v29 = vshrl.u32 %v893_v28, 16  ;;  %v894_v30 = vand.u32 65535, %v893_v28 }
0x1168   : > { %v897_v31 = vcvt.s32.f32 %v895_v29  ;;  %v896_v32 = vcvt.s32.f32 %v894_v30 }
0x116a   : > { %900 = vadd.xlane.f32.xlu0 %v897_v31  ;;  %898 = vadd.xlane.f32.xlu1 %v896_v32 }
0x11dd   : > { %v901_v33 = vpop.xlane.xlu0 %900  ;;  %v899_v34 = vpop.xlane.xlu1 %898 }
0x11de   : > { %v903_v35 = vcvt.f32.s32 %v901_v33  ;;  %v902_v37 = vcvt.f32.s32 %v899_v34 }
0x11e0   : > { %v904_v36 = vshll.u32 %v903_v35, 16 }
0x11e2   : > { %v905_v38 = vadd.s32 %v904_v36, %v902_v37 }
0x11e4   : > { %vm906_vm14 = vcmp.ge.s32.totalorder %v905_v38, 204 }
0x11e5   : > { %v908_v40 = vsel %vm906_vm14, %v907_v39, %v883_v18 }
0x11e6   : > { %v909_v41 = vadd.s32 %v908_v40, %v1298_v22  ;;  %v932_v59 = vadd.s32 1, %v908_v40 }
0x11e8   : > { %v910_v42 = vadd.s32 1, %v909_v41 }
0x11ea   : > { %vm911_vm15 = vcmp.ge.s32.totalorder %v1294_v2, %v910_v42 }
0x11eb   : > { %v912_v43 = vsel %vm911_vm15, 1, %v1183_v3 }
0x11ec   : > { %v913_v44 = vrot.slane %v912_v43, 4 }
0x11ee   : > { %v914_v45 = vadd.s32 %v913_v44, %v912_v43 }
0x11f0   : > { %v915_v46 = vrot.slane %v914_v45, 2 }
0x11f2   : > { %v916_v47 = vadd.s32 %v915_v46, %v914_v45 }
0x11f4   : > { %v917_v48 = vrot.slane %v916_v47, 1 }
0x11f6   : > { %v918_v49 = vadd.s32 %v917_v48, %v916_v47 }
0x11f8   : > { %v920_v50 = vshrl.u32 %v918_v49, 16  ;;  %v919_v51 = vand.u32 65535, %v918_v49 }
0x11fa   : > { %v922_v52 = vcvt.s32.f32 %v920_v50  ;;  %v921_v53 = vcvt.s32.f32 %v919_v51 }
0x11fc   : > { %925 = vadd.xlane.f32.xlu2 %v922_v52  ;;  %923 = vadd.xlane.f32.xlu0 %v921_v53 }
0x126f   : > { %v926_v54 = vpop.xlane.xlu2 %925  ;;  %v924_v55 = vpop.xlane.xlu0 %923 }
0x1270   : > { %v928_v56 = vcvt.f32.s32 %v926_v54  ;;  %v927_v57 = vcvt.f32.s32 %v924_v55 }
0x1272   : > { %v929_v3 = vshll.u32 %v928_v56, 16 }
0x1274   : > { %v930_v58 = vadd.s32 %v929_v3, %v927_v57 }
0x1276   : > { %vm931_vm0 = vcmp.ge.s32.totalorder %v930_v58, 204 }
0x1277   : > { %v933_v60 = vsel %vm931_vm0, %v932_v59, %v908_v40 }
0x1278   : > { %v934_v61 = vadd.s32 %v933_v60, %v1298_v22 }
0x127a   : > { %vm935_vm1 = vcmp.ge.s32.totalorder %v1294_v2, %v934_v61 }
0x127b   : > { %v936_v63 = vsel %vm935_vm1, %v1084_v62, 0.0 }
0x127c   : > { %937 = vst [vmem:[%s133_s26] sm:$0xff] %v936_v63 }
0x127d   : > { %1142 = shalt.err (!%p1139_p4)
}
0x127e   : > { %1038 = dma.vmem_to_hbm [thread:$0]  (%p1245_p11), %s952_s27, 128, %s954_s28, %s939_s10  }
0x127f PF: > { %s965_s13 = sand.u32 1, %s1169_s6   ;;  %p1439_p7 = scmp.ge.s32.totalorder %s1181_s9, 2 }
0x1280   : > { %s966_s14 = scalar_lea.sflag [#allocation4], %s965_s13 }
0x1281   : > { %p1045_p5 = pnand %p1439_p7, %p1249_p12 }
0x1283   : > { %p1046_p8 = pneg %p1045_p5 }
0x1285   : > { %1164 = dma.done.wait (%p1046_p8), %s966_s14, 128  }
0x1286   : > { %1166 = vsyncadd (%p1046_p8), %s966_s14, 4294967168  ;;  %p14_p10 = scmp.ge.s32.totalorder %s1220_s12, 4   ;;  %s1440_s6 = smov %s1173_s7 }
0x1287   : > { %s1441_s7 = smov %s1177_s8  ;;  %s1442_s8 = smov %s1232_s15 }
0x1288   : > { %s1443_s9 = smov %s1220_s12  ;;  %16 = sbr.rel (!%p14_p10) target bundleno = 5 (0x5), region = 69 }
0x128d   :  { %972 = vsyncpa [#allocation3], 1 }
0x128e   :  { %974 = vsyncpa [#allocation3 + $0x1], 1 }
0x128f   :  { %975 = vsyncpa [#allocation4], 1 }
0x1290   :  { %977 = vsyncpa [#allocation4 + $0x1], 1 }

</bundles_post_ra>
